<compile_context>
chip_gen: v6e
topology: v6e:2x2x1
jax: 0.10.0
libtpu: 0.0.40
codegen_flags: <defaults>
</compile_context>

<pallas_src>
import functools

import jax
import jax.numpy as jnp
from jax.experimental import pallas as pl
from jax.experimental.pallas import tpu as pltpu


# ----------------------------------------------------------------------------
# Fused kernel: ReLU + 1x1 conv + BatchNorm(batch stats) + ReLU + 3x3 conv
# ----------------------------------------------------------------------------
def fused_block_kernel(x_ref, w1_ref, gamma_ref, beta_ref, w2_ref, mask_ref,
                       o_ref, zext_ref, *, width, eps):
    # x_ref:     (M, Cin)        flattened NHWC input, M = N*H*W
    # w1_ref:    (Cin, Cmid)     1x1 conv weight
    # gamma_ref: (1, Cmid), beta_ref: (1, Cmid)
    # w2_ref:    (9, Cmid, Cout) 3x3 conv weight, taps flattened as kh*3+kw
    # mask_ref:  (M, 9)          1.0 where tap (kh,kw) source pixel is in-bounds
    # o_ref:     (M, Cout)
    # zext_ref:  VMEM scratch (M + 2*(width+1), Cmid): zero-bordered activations
    M = x_ref.shape[0]
    Cmid = w1_ref.shape[1]
    Cout = o_ref.shape[1]
    pad = width + 1  # covers the max flattened-row shift |dh*W + dw| = W + 1

    # --- ReLU + 1x1 conv: one MXU matmul over the whole slab. ---
    xr = jnp.maximum(x_ref[...], 0.0)
    y = jnp.dot(xr, w1_ref[...], preferred_element_type=jnp.float32)  # (M, Cmid)

    # --- BatchNorm2d, training-mode batch stats, single pass over y. ---
    s = jnp.sum(y, axis=0, keepdims=True)        # (1, Cmid)
    sq = jnp.sum(y * y, axis=0, keepdims=True)   # (1, Cmid)
    mean = s * (1.0 / M)
    var = sq * (1.0 / M) - mean * mean           # biased variance
    scale = gamma_ref[...] * jax.lax.rsqrt(var + eps)
    shift = beta_ref[...] - mean * scale
    z = jnp.maximum(y * scale + shift, 0.0)      # BN + ReLU, (M, Cmid)

    # --- Zero-bordered copy of z (flat rows) for the shifted tap reads. ---
    border = jnp.zeros((pad, Cmid), jnp.float32)
    zext_ref[0:pad, :] = border
    zext_ref[pad + M:2 * pad + M, :] = border
    zext_ref[pad:pad + M, :] = z

    # --- 3x3 conv (stride 1, pad 1): 9 full-slab matmuls, one accumulator. ---
    acc = jnp.zeros((M, Cout), jnp.float32)
    for kh in range(3):
        for kw in range(3):
            t = kh * 3 + kw
            shift_rows = (kh - 1) * width + (kw - 1)
            lo = pad + shift_rows
            src = zext_ref[lo:lo + M, :]              # row-shifted z, (M, Cmid)
            src = src * mask_ref[:, t:t + 1]          # zero out-of-range taps
            acc = acc + jnp.dot(src, w2_ref[t],
                                preferred_element_type=jnp.float32)
    o_ref[...] = acc                                  # single lane-contiguous store


# ----------------------------------------------------------------------------
# Wrapper: layout plumbing + pallas_call
# ----------------------------------------------------------------------------
def model_forward(x_nchw, params, *, eps=1e-5):
    N, Cin, H, W = x_nchw.shape
    w1 = params["w1"]                      # (Cin, Cmid)
    w2 = params["w2"]                      # (3, 3, Cmid, Cout), HWIO
    Cmid = w1.shape[1]
    Cout = w2.shape[-1]
    M = N * H * W

    # NCHW -> NHWC -> (M, Cin): channels on the 128-lane axis.
    x2d = jnp.transpose(x_nchw, (0, 2, 3, 1)).reshape(M, Cin)
    w2_taps = w2.reshape(9, Cmid, Cout)
    gamma2 = params["gamma"].reshape(1, Cmid)
    beta2 = params["beta"].reshape(1, Cmid)

    # Per-tap in-bounds masks (static; computed outside the kernel).
    r = jnp.arange(M)
    hh = (r % (H * W)) // W
    ww = r % W
    masks = []
    for kh in range(3):
        for kw in range(3):
            dh, dw = kh - 1, kw - 1
            valid = ((hh + dh >= 0) & (hh + dh < H) &
                     (ww + dw >= 0) & (ww + dw < W))
            masks.append(valid)
    tap_mask = jnp.stack(masks, axis=1).astype(jnp.float32)    # (M, 9)

    flops = 2 * M * Cin * Cmid + 2 * M * 9 * Cmid * Cout
    bytes_accessed = 4 * (M * Cin + Cin * Cmid + 2 * Cmid +
                          9 * Cmid * Cout + M * 9 + M * Cout)

    kernel = functools.partial(fused_block_kernel, width=W, eps=eps)

    # TODO(synk): at this problem size (M=49) a single full-slab block on one
    # TensorCore is optimal; for large N*H*W this should be tiled over M with a
    # "parallel" grid axis sized against v7x's 64 MiB VMEM.
    out2d = pl.pallas_call(
        kernel,
        out_shape=jax.ShapeDtypeStruct((M, Cout), jnp.float32),
        grid=(1,),
        in_specs=[
            pl.BlockSpec((M, Cin), lambda i: (0, 0)),
            pl.BlockSpec((Cin, Cmid), lambda i: (0, 0)),
            pl.BlockSpec((1, Cmid), lambda i: (0, 0)),
            pl.BlockSpec((1, Cmid), lambda i: (0, 0)),
            pl.BlockSpec((9, Cmid, Cout), lambda i: (0, 0, 0)),
            pl.BlockSpec((M, 9), lambda i: (0, 0)),
        ],
        out_specs=pl.BlockSpec((M, Cout), lambda i: (0, 0)),
        scratch_shapes=[pltpu.VMEM((M + 2 * (W + 1), Cmid), jnp.float32)],
        compiler_params=pltpu.CompilerParams(
            dimension_semantics=("arbitrary",)),
        cost_estimate=pl.CostEstimate(
            flops=flops, transcendentals=Cmid, bytes_accessed=bytes_accessed),
    )(x2d, w1, gamma2, beta2, w2_taps, tap_mask)

    out_nhwc = out2d.reshape(N, H, W, Cout)
    return jnp.transpose(out_nhwc, (0, 3, 1, 2))       # back to NCHW


# ----------------------------------------------------------------------------
# Pure-JAX reference (for correctness check only)
# ----------------------------------------------------------------------------
def reference(x_nchw, params, *, eps=1e-5):
    x = jnp.maximum(x_nchw, 0.0)
    x_nhwc = jnp.transpose(x, (0, 2, 3, 1))
    y = jnp.einsum("nhwc,cd->nhwd", x_nhwc, params["w1"])
    mean = y.mean(axis=(0, 1, 2))
    var = jnp.square(y - mean).mean(axis=(0, 1, 2))
    z = (y - mean) * jax.lax.rsqrt(var + eps) * params["gamma"] + params["beta"]
    z = jnp.maximum(z, 0.0)
    out = jax.lax.conv_general_dilated(
        z, params["w2"], window_strides=(1, 1), padding="SAME",
        dimension_numbers=("NHWC", "HWIO", "NHWC"))
    return jnp.transpose(out, (0, 3, 1, 2))


if __name__ == "__main__":
    Cin, Cmid, Cout = 1280, 128, 32
    N, H, W = 1, 7, 7

    key = jax.random.PRNGKey(0)
    k1, k2, k3, k4, k5 = jax.random.split(key, 5)
    params = {
        "w1": jax.random.normal(k1, (Cin, Cmid), jnp.float32) * 0.02,
        "w2": jax.random.normal(k2, (3, 3, Cmid, Cout), jnp.float32) * 0.05,
        "gamma": 1.0 + 0.1 * jax.random.normal(k3, (Cmid,), jnp.float32),
        "beta": 0.1 * jax.random.normal(k4, (Cmid,), jnp.float32),
    }
    x = jax.random.normal(k5, (N, Cin, H, W), jnp.float32)

    fwd = jax.jit(model_forward)
    out = jax.block_until_ready(fwd(x, params))
    assert out.shape == (N, Cout, H, W), out.shape

    ref = jax.block_until_ready(reference(x, params))
    assert jnp.allclose(out, ref, rtol=1e-3, atol=1e-3), (
        float(jnp.max(jnp.abs(out - ref))))

    print("KERNEL_OK")
</pallas_src>

<mosaic_0001>
module attributes {stable_mosaic.version = 11 : i64} {
  func.func @fused_block_kernel(%arg0: i32, %arg1: memref<49x1280xf32, #tpu.memory_space<vmem>>, %arg2: memref<1280x128xf32, #tpu.memory_space<vmem>>, %arg3: memref<1x128xf32, #tpu.memory_space<vmem>>, %arg4: memref<1x128xf32, #tpu.memory_space<vmem>>, %arg5: memref<9x128x32xf32, #tpu.memory_space<vmem>>, %arg6: memref<49x9xf32, #tpu.memory_space<vmem>>, %arg7: memref<49x32xf32, #tpu.memory_space<vmem>>, %arg8: memref<65x128xf32, #tpu.memory_space<vmem>>) attributes {dimension_semantics = [#tpu.dimension_semantics<arbitrary>], iteration_bounds = array<i64: 1>, scalar_prefetch = 0 : i64, scratch_operands = 1 : i64, tpu.core_type = #tpu.core_type<tc>, window_params = [{pipeline_mode = #tpu.pipeline_mode<synchronous>, transform_indices = @transform_0, window_bounds = array<i64: 49, 1280>}, {pipeline_mode = #tpu.pipeline_mode<synchronous>, transform_indices = @transform_1, window_bounds = array<i64: 1280, 128>}, {pipeline_mode = #tpu.pipeline_mode<synchronous>, transform_indices = @transform_2, window_bounds = array<i64: 1, 128>}, {pipeline_mode = #tpu.pipeline_mode<synchronous>, transform_indices = @transform_3, window_bounds = array<i64: 1, 128>}, {pipeline_mode = #tpu.pipeline_mode<synchronous>, transform_indices = @transform_4, window_bounds = array<i64: 9, 128, 32>}, {pipeline_mode = #tpu.pipeline_mode<synchronous>, transform_indices = @transform_5, window_bounds = array<i64: 49, 9>}, {pipeline_mode = #tpu.pipeline_mode<synchronous>, transform_indices = @transform_6, window_bounds = array<i64: 49, 32>}]} {
    %c0 = arith.constant 0 : index
    %c0_0 = arith.constant 0 : index
    %0 = vector.load %arg1[%c0, %c0_0] : memref<49x1280xf32, #tpu.memory_space<vmem>>, vector<49x1280xf32>
    %cst = arith.constant 0.000000e+00 : f32
    %1 = vector.broadcast %cst : f32 to vector<49x1280xf32>
    %2 = arith.maximumf %0, %1 : vector<49x1280xf32>
    %c0_1 = arith.constant 0 : index
    %c0_2 = arith.constant 0 : index
    %3 = vector.load %arg2[%c0_1, %c0_2] : memref<1280x128xf32, #tpu.memory_space<vmem>>, vector<1280x128xf32>
    %cst_3 = arith.constant dense<0.000000e+00> : vector<49x128xf32>
    %4 = tpu.matmul %2, %3, %cst_3 {dimension_numbers = #tpu.dot_dimension_numbers<[1], [0], [0], [1], [0, 0, 1, 1], [], []>} : vector<49x1280xf32>, vector<1280x128xf32>, vector<49x128xf32> -> vector<49x128xf32>
    %cst_4 = arith.constant dense<0.000000e+00> : vector<128xf32>
    %5 = vector.multi_reduction <add>, %4, %cst_4 [0] : vector<49x128xf32> to vector<128xf32>
    %6 = vector.shape_cast %5 : vector<128xf32> to vector<1x128xf32>
    %7 = arith.mulf %4, %4 : vector<49x128xf32>
    %cst_5 = arith.constant dense<0.000000e+00> : vector<128xf32>
    %8 = vector.multi_reduction <add>, %7, %cst_5 [0] : vector<49x128xf32> to vector<128xf32>
    %9 = vector.shape_cast %8 : vector<128xf32> to vector<1x128xf32>
    %cst_6 = arith.constant 0.0204081628 : f32
    %10 = vector.broadcast %cst_6 : f32 to vector<1x128xf32>
    %11 = arith.mulf %6, %10 : vector<1x128xf32>
    %cst_7 = arith.constant 0.0204081628 : f32
    %12 = vector.broadcast %cst_7 : f32 to vector<1x128xf32>
    %13 = arith.mulf %9, %12 : vector<1x128xf32>
    %14 = arith.mulf %11, %11 : vector<1x128xf32>
    %15 = arith.subf %13, %14 : vector<1x128xf32>
    %c0_8 = arith.constant 0 : index
    %c0_9 = arith.constant 0 : index
    %16 = vector.load %arg3[%c0_8, %c0_9] : memref<1x128xf32, #tpu.memory_space<vmem>>, vector<1x128xf32>
    %cst_10 = arith.constant 9.99999974E-6 : f32
    %17 = vector.broadcast %cst_10 : f32 to vector<1x128xf32>
    %18 = arith.addf %15, %17 : vector<1x128xf32>
    %19 = math.rsqrt %18 : vector<1x128xf32>
    %20 = arith.mulf %16, %19 : vector<1x128xf32>
    %c0_11 = arith.constant 0 : index
    %c0_12 = arith.constant 0 : index
    %21 = vector.load %arg4[%c0_11, %c0_12] : memref<1x128xf32, #tpu.memory_space<vmem>>, vector<1x128xf32>
    %22 = arith.mulf %11, %20 : vector<1x128xf32>
    %23 = arith.subf %21, %22 : vector<1x128xf32>
    %24 = vector.broadcast %20 : vector<1x128xf32> to vector<49x128xf32>
    %25 = arith.mulf %4, %24 : vector<49x128xf32>
    %26 = vector.broadcast %23 : vector<1x128xf32> to vector<49x128xf32>
    %27 = arith.addf %25, %26 : vector<49x128xf32>
    %cst_13 = arith.constant 0.000000e+00 : f32
    %28 = vector.broadcast %cst_13 : f32 to vector<49x128xf32>
    %29 = arith.maximumf %27, %28 : vector<49x128xf32>
    %cst_14 = arith.constant 0.000000e+00 : f32
    %30 = vector.broadcast %cst_14 : f32 to vector<8x128xf32>
    %c0_15 = arith.constant 0 : index
    %c0_16 = arith.constant 0 : index
    %31 = vector.load %arg8[%c0_15, %c0_16] : memref<65x128xf32, #tpu.memory_space<vmem>>, vector<8x128xf32>
    tpu.vector_store %arg8[%c0_15, %c0_16], %30 {strides = array<i32>} : memref<65x128xf32, #tpu.memory_space<vmem>>, vector<8x128xf32>,
    %c57 = arith.constant 57 : index
    %c0_17 = arith.constant 0 : index
    %32 = vector.load %arg8[%c57, %c0_17] : memref<65x128xf32, #tpu.memory_space<vmem>>, vector<8x128xf32>
    tpu.vector_store %arg8[%c57, %c0_17], %30 {strides = array<i32>} : memref<65x128xf32, #tpu.memory_space<vmem>>, vector<8x128xf32>,
    %c8 = arith.constant 8 : index
    %c0_18 = arith.constant 0 : index
    %33 = vector.load %arg8[%c8, %c0_18] : memref<65x128xf32, #tpu.memory_space<vmem>>, vector<49x128xf32>
    tpu.vector_store %arg8[%c8, %c0_18], %29 {strides = array<i32>} : memref<65x128xf32, #tpu.memory_space<vmem>>, vector<49x128xf32>,
    %cst_19 = arith.constant 0.000000e+00 : f32
    %34 = vector.broadcast %cst_19 : f32 to vector<49x32xf32>
    %c0_20 = arith.constant 0 : index
    %c0_21 = arith.constant 0 : index
    %35 = vector.load %arg8[%c0_20, %c0_21] : memref<65x128xf32, #tpu.memory_space<vmem>>, vector<49x128xf32>
    %c0_22 = arith.constant 0 : index
    %c0_23 = arith.constant 0 : index
    %36 = vector.load %arg6[%c0_22, %c0_23] : memref<49x9xf32, #tpu.memory_space<vmem>>, vector<49x1xf32>
    %37 = vector.broadcast %36 : vector<49x1xf32> to vector<49x128xf32>
    %38 = arith.mulf %35, %37 : vector<49x128xf32>
    %c0_24 = arith.constant 0 : index
    %c0_25 = arith.constant 0 : index
    %c0_26 = arith.constant 0 : index
    %39 = vector.load %arg5[%c0_24, %c0_25, %c0_26] : memref<9x128x32xf32, #tpu.memory_space<vmem>>, vector<1x128x32xf32>
    %40 = vector.shape_cast %39 : vector<1x128x32xf32> to vector<128x32xf32>
    %cst_27 = arith.constant dense<0.000000e+00> : vector<49x32xf32>
    %41 = tpu.matmul %38, %40, %cst_27 {dimension_numbers = #tpu.dot_dimension_numbers<[1], [0], [0], [1], [0, 0, 1, 1], [], []>} : vector<49x128xf32>, vector<128x32xf32>, vector<49x32xf32> -> vector<49x32xf32>
    %42 = arith.addf %34, %41 : vector<49x32xf32>
    %c1 = arith.constant 1 : index
    %c0_28 = arith.constant 0 : index
    %43 = vector.load %arg8[%c1, %c0_28] : memref<65x128xf32, #tpu.memory_space<vmem>>, vector<49x128xf32>
    %c0_29 = arith.constant 0 : index
    %c1_30 = arith.constant 1 : index
    %44 = vector.load %arg6[%c0_29, %c1_30] : memref<49x9xf32, #tpu.memory_space<vmem>>, vector<49x1xf32>
    %45 = vector.broadcast %44 : vector<49x1xf32> to vector<49x128xf32>
    %46 = arith.mulf %43, %45 : vector<49x128xf32>
    %c1_31 = arith.constant 1 : index
    %c0_32 = arith.constant 0 : index
    %c0_33 = arith.constant 0 : index
    %47 = vector.load %arg5[%c1_31, %c0_32, %c0_33] : memref<9x128x32xf32, #tpu.memory_space<vmem>>, vector<1x128x32xf32>
    %48 = vector.shape_cast %47 : vector<1x128x32xf32> to vector<128x32xf32>
    %cst_34 = arith.constant dense<0.000000e+00> : vector<49x32xf32>
    %49 = tpu.matmul %46, %48, %cst_34 {dimension_numbers = #tpu.dot_dimension_numbers<[1], [0], [0], [1], [0, 0, 1, 1], [], []>} : vector<49x128xf32>, vector<128x32xf32>, vector<49x32xf32> -> vector<49x32xf32>
    %50 = arith.addf %42, %49 : vector<49x32xf32>
    %c2 = arith.constant 2 : index
    %c0_35 = arith.constant 0 : index
    %51 = vector.load %arg8[%c2, %c0_35] : memref<65x128xf32, #tpu.memory_space<vmem>>, vector<49x128xf32>
    %c0_36 = arith.constant 0 : index
    %c2_37 = arith.constant 2 : index
    %52 = vector.load %arg6[%c0_36, %c2_37] : memref<49x9xf32, #tpu.memory_space<vmem>>, vector<49x1xf32>
    %53 = vector.broadcast %52 : vector<49x1xf32> to vector<49x128xf32>
    %54 = arith.mulf %51, %53 : vector<49x128xf32>
    %c2_38 = arith.constant 2 : index
    %c0_39 = arith.constant 0 : index
    %c0_40 = arith.constant 0 : index
    %55 = vector.load %arg5[%c2_38, %c0_39, %c0_40] : memref<9x128x32xf32, #tpu.memory_space<vmem>>, vector<1x128x32xf32>
    %56 = vector.shape_cast %55 : vector<1x128x32xf32> to vector<128x32xf32>
    %cst_41 = arith.constant dense<0.000000e+00> : vector<49x32xf32>
    %57 = tpu.matmul %54, %56, %cst_41 {dimension_numbers = #tpu.dot_dimension_numbers<[1], [0], [0], [1], [0, 0, 1, 1], [], []>} : vector<49x128xf32>, vector<128x32xf32>, vector<49x32xf32> -> vector<49x32xf32>
    %58 = arith.addf %50, %57 : vector<49x32xf32>
    %c7 = arith.constant 7 : index
    %c0_42 = arith.constant 0 : index
    %59 = vector.load %arg8[%c7, %c0_42] : memref<65x128xf32, #tpu.memory_space<vmem>>, vector<49x128xf32>
    %c0_43 = arith.constant 0 : index
    %c3 = arith.constant 3 : index
    %60 = vector.load %arg6[%c0_43, %c3] : memref<49x9xf32, #tpu.memory_space<vmem>>, vector<49x1xf32>
    %61 = vector.broadcast %60 : vector<49x1xf32> to vector<49x128xf32>
    %62 = arith.mulf %59, %61 : vector<49x128xf32>
    %c3_44 = arith.constant 3 : index
    %c0_45 = arith.constant 0 : index
    %c0_46 = arith.constant 0 : index
    %63 = vector.load %arg5[%c3_44, %c0_45, %c0_46] : memref<9x128x32xf32, #tpu.memory_space<vmem>>, vector<1x128x32xf32>
    %64 = vector.shape_cast %63 : vector<1x128x32xf32> to vector<128x32xf32>
    %cst_47 = arith.constant dense<0.000000e+00> : vector<49x32xf32>
    %65 = tpu.matmul %62, %64, %cst_47 {dimension_numbers = #tpu.dot_dimension_numbers<[1], [0], [0], [1], [0, 0, 1, 1], [], []>} : vector<49x128xf32>, vector<128x32xf32>, vector<49x32xf32> -> vector<49x32xf32>
    %66 = arith.addf %58, %65 : vector<49x32xf32>
    %c8_48 = arith.constant 8 : index
    %c0_49 = arith.constant 0 : index
    %67 = vector.load %arg8[%c8_48, %c0_49] : memref<65x128xf32, #tpu.memory_space<vmem>>, vector<49x128xf32>
    %c0_50 = arith.constant 0 : index
    %c4 = arith.constant 4 : index
    %68 = vector.load %arg6[%c0_50, %c4] : memref<49x9xf32, #tpu.memory_space<vmem>>, vector<49x1xf32>
    %69 = vector.broadcast %68 : vector<49x1xf32> to vector<49x128xf32>
    %70 = arith.mulf %67, %69 : vector<49x128xf32>
    %c4_51 = arith.constant 4 : index
    %c0_52 = arith.constant 0 : index
    %c0_53 = arith.constant 0 : index
    %71 = vector.load %arg5[%c4_51, %c0_52, %c0_53] : memref<9x128x32xf32, #tpu.memory_space<vmem>>, vector<1x128x32xf32>
    %72 = vector.shape_cast %71 : vector<1x128x32xf32> to vector<128x32xf32>
    %cst_54 = arith.constant dense<0.000000e+00> : vector<49x32xf32>
    %73 = tpu.matmul %70, %72, %cst_54 {dimension_numbers = #tpu.dot_dimension_numbers<[1], [0], [0], [1], [0, 0, 1, 1], [], []>} : vector<49x128xf32>, vector<128x32xf32>, vector<49x32xf32> -> vector<49x32xf32>
    %74 = arith.addf %66, %73 : vector<49x32xf32>
    %c9 = arith.constant 9 : index
    %c0_55 = arith.constant 0 : index
    %75 = vector.load %arg8[%c9, %c0_55] : memref<65x128xf32, #tpu.memory_space<vmem>>, vector<49x128xf32>
    %c0_56 = arith.constant 0 : index
    %c5 = arith.constant 5 : index
    %76 = vector.load %arg6[%c0_56, %c5] : memref<49x9xf32, #tpu.memory_space<vmem>>, vector<49x1xf32>
    %77 = vector.broadcast %76 : vector<49x1xf32> to vector<49x128xf32>
    %78 = arith.mulf %75, %77 : vector<49x128xf32>
    %c5_57 = arith.constant 5 : index
    %c0_58 = arith.constant 0 : index
    %c0_59 = arith.constant 0 : index
    %79 = vector.load %arg5[%c5_57, %c0_58, %c0_59] : memref<9x128x32xf32, #tpu.memory_space<vmem>>, vector<1x128x32xf32>
    %80 = vector.shape_cast %79 : vector<1x128x32xf32> to vector<128x32xf32>
    %cst_60 = arith.constant dense<0.000000e+00> : vector<49x32xf32>
    %81 = tpu.matmul %78, %80, %cst_60 {dimension_numbers = #tpu.dot_dimension_numbers<[1], [0], [0], [1], [0, 0, 1, 1], [], []>} : vector<49x128xf32>, vector<128x32xf32>, vector<49x32xf32> -> vector<49x32xf32>
    %82 = arith.addf %74, %81 : vector<49x32xf32>
    %c14 = arith.constant 14 : index
    %c0_61 = arith.constant 0 : index
    %83 = vector.load %arg8[%c14, %c0_61] : memref<65x128xf32, #tpu.memory_space<vmem>>, vector<49x128xf32>
    %c0_62 = arith.constant 0 : index
    %c6 = arith.constant 6 : index
    %84 = vector.load %arg6[%c0_62, %c6] : memref<49x9xf32, #tpu.memory_space<vmem>>, vector<49x1xf32>
    %85 = vector.broadcast %84 : vector<49x1xf32> to vector<49x128xf32>
    %86 = arith.mulf %83, %85 : vector<49x128xf32>
    %c6_63 = arith.constant 6 : index
    %c0_64 = arith.constant 0 : index
    %c0_65 = arith.constant 0 : index
    %87 = vector.load %arg5[%c6_63, %c0_64, %c0_65] : memref<9x128x32xf32, #tpu.memory_space<vmem>>, vector<1x128x32xf32>
    %88 = vector.shape_cast %87 : vector<1x128x32xf32> to vector<128x32xf32>
    %cst_66 = arith.constant dense<0.000000e+00> : vector<49x32xf32>
    %89 = tpu.matmul %86, %88, %cst_66 {dimension_numbers = #tpu.dot_dimension_numbers<[1], [0], [0], [1], [0, 0, 1, 1], [], []>} : vector<49x128xf32>, vector<128x32xf32>, vector<49x32xf32> -> vector<49x32xf32>
    %90 = arith.addf %82, %89 : vector<49x32xf32>
    %c15 = arith.constant 15 : index
    %c0_67 = arith.constant 0 : index
    %91 = vector.load %arg8[%c15, %c0_67] : memref<65x128xf32, #tpu.memory_space<vmem>>, vector<49x128xf32>
    %c0_68 = arith.constant 0 : index
    %c7_69 = arith.constant 7 : index
    %92 = vector.load %arg6[%c0_68, %c7_69] : memref<49x9xf32, #tpu.memory_space<vmem>>, vector<49x1xf32>
    %93 = vector.broadcast %92 : vector<49x1xf32> to vector<49x128xf32>
    %94 = arith.mulf %91, %93 : vector<49x128xf32>
    %c7_70 = arith.constant 7 : index
    %c0_71 = arith.constant 0 : index
    %c0_72 = arith.constant 0 : index
    %95 = vector.load %arg5[%c7_70, %c0_71, %c0_72] : memref<9x128x32xf32, #tpu.memory_space<vmem>>, vector<1x128x32xf32>
    %96 = vector.shape_cast %95 : vector<1x128x32xf32> to vector<128x32xf32>
    %cst_73 = arith.constant dense<0.000000e+00> : vector<49x32xf32>
    %97 = tpu.matmul %94, %96, %cst_73 {dimension_numbers = #tpu.dot_dimension_numbers<[1], [0], [0], [1], [0, 0, 1, 1], [], []>} : vector<49x128xf32>, vector<128x32xf32>, vector<49x32xf32> -> vector<49x32xf32>
    %98 = arith.addf %90, %97 : vector<49x32xf32>
    %c16 = arith.constant 16 : index
    %c0_74 = arith.constant 0 : index
    %99 = vector.load %arg8[%c16, %c0_74] : memref<65x128xf32, #tpu.memory_space<vmem>>, vector<49x128xf32>
    %c0_75 = arith.constant 0 : index
    %c8_76 = arith.constant 8 : index
    %100 = vector.load %arg6[%c0_75, %c8_76] : memref<49x9xf32, #tpu.memory_space<vmem>>, vector<49x1xf32>
    %101 = vector.broadcast %100 : vector<49x1xf32> to vector<49x128xf32>
    %102 = arith.mulf %99, %101 : vector<49x128xf32>
    %c8_77 = arith.constant 8 : index
    %c0_78 = arith.constant 0 : index
    %c0_79 = arith.constant 0 : index
    %103 = vector.load %arg5[%c8_77, %c0_78, %c0_79] : memref<9x128x32xf32, #tpu.memory_space<vmem>>, vector<1x128x32xf32>
    %104 = vector.shape_cast %103 : vector<1x128x32xf32> to vector<128x32xf32>
    %cst_80 = arith.constant dense<0.000000e+00> : vector<49x32xf32>
    %105 = tpu.matmul %102, %104, %cst_80 {dimension_numbers = #tpu.dot_dimension_numbers<[1], [0], [0], [1], [0, 0, 1, 1], [], []>} : vector<49x128xf32>, vector<128x32xf32>, vector<49x32xf32> -> vector<49x32xf32>
    %106 = arith.addf %98, %105 : vector<49x32xf32>
    %c0_81 = arith.constant 0 : index
    %c0_82 = arith.constant 0 : index
    %107 = vector.load %arg7[%c0_81, %c0_82] : memref<49x32xf32, #tpu.memory_space<vmem>>, vector<49x32xf32>
    tpu.vector_store %arg7[%c0_81, %c0_82], %106 {strides = array<i32>} : memref<49x32xf32, #tpu.memory_space<vmem>>, vector<49x32xf32>,
    return
  }
  func.func @transform_0(%arg0: i32) -> (i32, i32) {
    %c0_i32 = arith.constant 0 : i32
    %c0_i32_0 = arith.constant 0 : i32
    %c0_i32_1 = arith.constant 0 : i32
    return %c0_i32, %c0_i32_0 : i32, i32
  }
  func.func @transform_1(%arg0: i32) -> (i32, i32) {
    %c0_i32 = arith.constant 0 : i32
    %c0_i32_0 = arith.constant 0 : i32
    %c0_i32_1 = arith.constant 0 : i32
    return %c0_i32, %c0_i32_0 : i32, i32
  }
  func.func @transform_2(%arg0: i32) -> (i32, i32) {
    %c0_i32 = arith.constant 0 : i32
    %c0_i32_0 = arith.constant 0 : i32
    %c0_i32_1 = arith.constant 0 : i32
    return %c0_i32, %c0_i32_0 : i32, i32
  }
  func.func @transform_3(%arg0: i32) -> (i32, i32) {
    %c0_i32 = arith.constant 0 : i32
    %c0_i32_0 = arith.constant 0 : i32
    %c0_i32_1 = arith.constant 0 : i32
    return %c0_i32, %c0_i32_0 : i32, i32
  }
  func.func @transform_4(%arg0: i32) -> (i32, i32, i32) {
    %c0_i32 = arith.constant 0 : i32
    %c0_i32_0 = arith.constant 0 : i32
    %c0_i32_1 = arith.constant 0 : i32
    %c0_i32_2 = arith.constant 0 : i32
    return %c0_i32, %c0_i32_0, %c0_i32_1 : i32, i32, i32
  }
  func.func @transform_5(%arg0: i32) -> (i32, i32) {
    %c0_i32 = arith.constant 0 : i32
    %c0_i32_0 = arith.constant 0 : i32
    %c0_i32_1 = arith.constant 0 : i32
    return %c0_i32, %c0_i32_0 : i32, i32
  }
  func.func @transform_6(%arg0: i32) -> (i32, i32) {
    %c0_i32 = arith.constant 0 : i32
    %c0_i32_0 = arith.constant 0 : i32
    %c0_i32_1 = arith.constant 0 : i32
    return %c0_i32, %c0_i32_0 : i32, i32
  }
}

</mosaic_0001>

<bundles_post_ra>
// kernel: model_forward.1
= control target key start
LH: loop header
LB: loop body
LE: loop exit
PB: predicated region body
PF: predicated region fallthrough
CT: control target
= control target key end

     0   :  { %v3551_v3 = vmov 1   ;;  %vm3561_vm0 = vmmov 0   ;;  %vm828_vm1 = vcmask 1040384   ;;  %vm2403_vm2 = vcmask 261120   ;;  %s5482_s1 = inlined_call_operand.vmem [shape: f32[1280,128], index: 1, kind: input, shape index: {}]   ;;  %s5483_s0 = inlined_call_operand.vmem [shape: f32[49,1280], index: 0, kind: input, shape index: {}]   ;;  %s5484_s5 = inlined_call_operand.vmem [shape: f32[49,9], index: 5, kind: input, shape index: {}]   ;;  %s5485_s4 = inlined_call_operand.vmem [shape: f32[9,128,32], index: 4, kind: input, shape index: {}]   ;;  %s5486_s2 = inlined_call_operand.vmem [shape: f32[1,128], index: 2, kind: input, shape index: {}]   ;;  %s5487_s3 = inlined_call_operand.vmem [shape: f32[1,128], index: 3, kind: input, shape index: {}]   ;;  %s5488_s6 = inlined_call_operand.vmem [shape: f32[49,32], index: 6, kind: output, shape index: {}]  }
   0x1   :  { %v194_v0 = vld [vmem:[%s5482_s1 + $0xf8] sm:$0xff]  ;;  %3505 = vset.pattern.permute.xlu1 %v3551_v3  ;;  %3504 = vset.pattern.permute.xlu0 %v3551_v3  ;;  %v193_v5 = vld [vmem:[%s5482_s1 + $0xf0] sm:$0xff]  ;;  %v192_v9 = vld [vmem:[%s5482_s1 + $0xe8] sm:$0xff]  ;;  %vm2410_vm3 = vcmask 253952  }
   0x2   :  { %v226_v1 = vld [vmem:[%s5482_s1 + $0x1f8] sm:$0xff]  ;;  %2544 = vmatprep.subr.mxu0 %v194_v0  ;;  %v225_v6 = vld [vmem:[%s5482_s1 + $0x1f0] sm:$0xff]  ;;  %v224_v10 = vld [vmem:[%s5482_s1 + $0x1e8] sm:$0xff] }
   0x3   :  { %v178_v2 = vld [vmem:[%s5482_s1 + $0x78] sm:$0xff]  ;;  %2597 = vmatprep.subr.mxu1 %v226_v1  ;;  %v177_v7 = vld [vmem:[%s5482_s1 + $0x70] sm:$0xff]  ;;  %v176_v11 = vld [vmem:[%s5482_s1 + $0x68] sm:$0xff] }
   0x4   :  { %v210_v4 = vld [vmem:[%s5482_s1 + $0x178] sm:$0xff]  ;;  %2545 = vmatpush3.msra.mxu0 %v178_v2  ;;  %v209_v8 = vld [vmem:[%s5482_s1 + $0x170] sm:$0xff]  ;;  %v208_v12 = vld [vmem:[%s5482_s1 + $0x168] sm:$0xff] }
   0x5   :  { %2598 = vmatpush3.msra.mxu1 %v210_v4  ;;  %2546 = vmatprep.subr.mxu0 %v193_v5  ;;  %v191_v13 = vld [vmem:[%s5482_s1 + $0xe0] sm:$0xff]  ;;  %v190_v17 = vld [vmem:[%s5482_s1 + $0xd8] sm:$0xff]  ;;  %v189_v21 = vld [vmem:[%s5482_s1 + $0xd0] sm:$0xff] }
   0x6   :  { %2599 = vmatprep.subr.mxu1 %v225_v6  ;;  %2547 = vmatpush3.msra.mxu0 %v177_v7  ;;  %v223_v14 = vld [vmem:[%s5482_s1 + $0x1e0] sm:$0xff]  ;;  %v222_v18 = vld [vmem:[%s5482_s1 + $0x1d8] sm:$0xff]  ;;  %v221_v22 = vld [vmem:[%s5482_s1 + $0x1d0] sm:$0xff] }
   0x7   :  { %2600 = vmatpush3.msra.mxu1 %v209_v8  ;;  %2548 = vmatprep.subr.mxu0 %v192_v9  ;;  %v175_v15 = vld [vmem:[%s5482_s1 + $0x60] sm:$0xff]  ;;  %v174_v19 = vld [vmem:[%s5482_s1 + $0x58] sm:$0xff]  ;;  %v173_v23 = vld [vmem:[%s5482_s1 + $0x50] sm:$0xff] }
   0x8   :  { %2601 = vmatprep.subr.mxu1 %v224_v10  ;;  %v207_v16 = vld [vmem:[%s5482_s1 + $0x160] sm:$0xff]  ;;  %2549 = vmatpush3.msra.mxu0 %v176_v11  ;;  %v206_v20 = vld [vmem:[%s5482_s1 + $0x158] sm:$0xff]  ;;  %v205_v24 = vld [vmem:[%s5482_s1 + $0x150] sm:$0xff] }
   0x9   :  { %2602 = vmatpush3.msra.mxu1 %v208_v12  ;;  %2550 = vmatprep.subr.mxu0 %v191_v13  ;;  %v188_v25 = vld [vmem:[%s5482_s1 + $0xc8] sm:$0xff]  ;;  %v187_v29 = vld [vmem:[%s5482_s1 + $0xc0] sm:$0xff]  ;;  %v186_v33 = vld [vmem:[%s5482_s1 + $0xb8] sm:$0xff] }
   0xa   :  { %2603 = vmatprep.subr.mxu1 %v223_v14  ;;  %2551 = vmatpush3.msra.mxu0 %v175_v15  ;;  %v220_v26 = vld [vmem:[%s5482_s1 + $0x1c8] sm:$0xff]  ;;  %v219_v30 = vld [vmem:[%s5482_s1 + $0x1c0] sm:$0xff]  ;;  %v218_v34 = vld [vmem:[%s5482_s1 + $0x1b8] sm:$0xff] }
   0xb   :  { %2604 = vmatpush3.msra.mxu1 %v207_v16  ;;  %2552 = vmatprep.subr.mxu0 %v190_v17  ;;  %v172_v27 = vld [vmem:[%s5482_s1 + $0x48] sm:$0xff]  ;;  %v171_v31 = vld [vmem:[%s5482_s1 + $0x40] sm:$0xff]  ;;  %v170_v35 = vld [vmem:[%s5482_s1 + $0x38] sm:$0xff] }
   0xc   :  { %2605 = vmatprep.subr.mxu1 %v222_v18  ;;  %2553 = vmatpush3.msra.mxu0 %v174_v19  ;;  %v204_v28 = vld [vmem:[%s5482_s1 + $0x148] sm:$0xff]  ;;  %v203_v32 = vld [vmem:[%s5482_s1 + $0x140] sm:$0xff]  ;;  %v202_v36 = vld [vmem:[%s5482_s1 + $0x138] sm:$0xff] }
   0xd   :  { %2606 = vmatpush3.msra.mxu1 %v206_v20  ;;  %2554 = vmatprep.subr.mxu0 %v189_v21  ;;  %v185_v37 = vld [vmem:[%s5482_s1 + $0xb0] sm:$0xff]  ;;  %v184_v41 = vld [vmem:[%s5482_s1 + $0xa8] sm:$0xff]  ;;  %v183_v45 = vld [vmem:[%s5482_s1 + $0xa0] sm:$0xff] }
   0xe   :  { %2607 = vmatprep.subr.mxu1 %v221_v22  ;;  %2555 = vmatpush3.msra.mxu0 %v173_v23  ;;  %v217_v38 = vld [vmem:[%s5482_s1 + $0x1b0] sm:$0xff]  ;;  %v216_v42 = vld [vmem:[%s5482_s1 + $0x1a8] sm:$0xff]  ;;  %v215_v46 = vld [vmem:[%s5482_s1 + $0x1a0] sm:$0xff] }
   0xf   :  { %2608 = vmatpush3.msra.mxu1 %v205_v24  ;;  %2556 = vmatprep.subr.mxu0 %v188_v25  ;;  %v169_v39 = vld [vmem:[%s5482_s1 + $0x30] sm:$0xff]  ;;  %v168_v43 = vld [vmem:[%s5482_s1 + $0x28] sm:$0xff]  ;;  %v167_v47 = vld [vmem:[%s5482_s1 + $0x20] sm:$0xff] }
  0x10   :  { %2609 = vmatprep.subr.mxu1 %v220_v26  ;;  %2557 = vmatpush3.msra.mxu0 %v172_v27  ;;  %v201_v40 = vld [vmem:[%s5482_s1 + $0x130] sm:$0xff]  ;;  %v200_v44 = vld [vmem:[%s5482_s1 + $0x128] sm:$0xff]  ;;  %v199_v48 = vld [vmem:[%s5482_s1 + $0x120] sm:$0xff] }
  0x11   :  { %2610 = vmatpush3.msra.mxu1 %v204_v28  ;;  %2558 = vmatprep.subr.mxu0 %v187_v29  ;;  %v182_v49 = vld [vmem:[%s5482_s1 + $0x98] sm:$0xff]  ;;  %v181_v53 = vld [vmem:[%s5482_s1 + $0x90] sm:$0xff]  ;;  %v180_v57 = vld [vmem:[%s5482_s1 + $0x88] sm:$0xff] }
  0x12   :  { %2611 = vmatprep.subr.mxu1 %v219_v30  ;;  %2559 = vmatpush3.msra.mxu0 %v171_v31  ;;  %v214_v50 = vld [vmem:[%s5482_s1 + $0x198] sm:$0xff]  ;;  %v213_v54 = vld [vmem:[%s5482_s1 + $0x190] sm:$0xff]  ;;  %v24_v58 = vld [vmem:[%s5483_s0 + $0x8] sm:$0xff] }
  0x13   :  { %2612 = vmatpush3.msra.mxu1 %v203_v32  ;;  %2560 = vmatprep.subr.mxu0 %v186_v33  ;;  %v166_v51 = vld [vmem:[%s5482_s1 + $0x18] sm:$0xff]  ;;  %v165_v55 = vld [vmem:[%s5482_s1 + $0x10] sm:$0xff]  ;;  %v212_v59 = vld [vmem:[%s5482_s1 + $0x188] sm:$0xff]  ;;  %v94_v3 = vmax.f32 %v24_v58, 0.0 }
  0x14   :  { %2613 = vmatprep.subr.mxu1 %v218_v34  ;;  %2561 = vmatpush3.msra.mxu0 %v170_v35  ;;  %v198_v52 = vld [vmem:[%s5482_s1 + $0x118] sm:$0xff]  ;;  %v197_v56 = vld [vmem:[%s5482_s1 + $0x110] sm:$0xff]  ;;  %v164_v60 = vld [vmem:[%s5482_s1 + $0x8] sm:$0xff] }
  0x15   :  { %2614 = vmatpush3.msra.mxu1 %v202_v36  ;;  %2562 = vmatprep.subr.mxu0 %v185_v37  ;;  %v26_v61 = vld [vmem:[%s5483_s0 + $0x18] sm:$0xff]  ;;  %v196_v62 = vld [vmem:[%s5482_s1 + $0x108] sm:$0xff]  ;;  %v23_v63 = vld [vmem:[%s5483_s0] sm:$0xff] }
  0x16   :  { %2615 = vmatprep.subr.mxu1 %v217_v38  ;;  %2563 = vmatpush3.msra.mxu0 %v169_v39  ;;  %v25_v0 = vld [vmem:[%s5483_s0 + $0x10] sm:$0xff]  ;;  %v179_v1 = vld [vmem:[%s5482_s1 + $0x80] sm:$0xff]  ;;  %v96_v5 = vmax.f32 %v26_v61, 0.0  ;;  %v93_v7 = vmax.f32 %v23_v63, 0.0  ;;  %v258_v9 = vld [vmem:[%s5482_s1 + $0x2f8] sm:$0xff] }
  0x17   :  { %2616 = vmatpush3.msra.mxu1 %v201_v40  ;;  %2564 = vmatprep.subr.mxu0 %v184_v41  ;;  %v211_v2 = vld [vmem:[%s5482_s1 + $0x180] sm:$0xff]  ;;  %v95_v8 = vmax.f32 %v25_v0, 0.0  ;;  %v290_v10 = vld [vmem:[%s5482_s1 + $0x3f8] sm:$0xff]  ;;  %v36_v14 = vld [vmem:[%s5483_s0 + $0x68] sm:$0xff] }
  0x18   :  { %2617 = vmatprep.subr.mxu1 %v216_v42  ;;  %2565 = vmatpush3.msra.mxu0 %v168_v43  ;;  %v163_v4 = vld [vmem:[%s5482_s1] sm:$0xff]  ;;  %v34_v11 = vld [vmem:[%s5483_s0 + $0x58] sm:$0xff]  ;;  %v257_v15 = vld [vmem:[%s5482_s1 + $0x2f0] sm:$0xff]  ;;  %v106_v23 = vmax.f32 %v36_v14, 0.0 }
  0x19   :  { %2618 = vmatpush3.msra.mxu1 %v200_v44  ;;  %2566 = vmatprep.subr.mxu0 %v183_v45  ;;  %v195_v6 = vld [vmem:[%s5482_s1 + $0x100] sm:$0xff]  ;;  %v242_v12 = vld [vmem:[%s5482_s1 + $0x278] sm:$0xff]  ;;  %v241_v16 = vld [vmem:[%s5482_s1 + $0x270] sm:$0xff]  ;;  %v104_v19 = vmax.f32 %v34_v11, 0.0 }
  0x1a   :  { %2619 = vmatprep.subr.mxu1 %v215_v46  ;;  %2567 = vmatpush3.msra.mxu0 %v167_v47  ;;  %v274_v13 = vld [vmem:[%s5482_s1 + $0x378] sm:$0xff]  ;;  %v289_v17 = vld [vmem:[%s5482_s1 + $0x3f0] sm:$0xff]  ;;  %v35_v21 = vld [vmem:[%s5483_s0 + $0x60] sm:$0xff] }
  0x1b   :  { %2620 = vmatpush3.msra.mxu1 %v199_v48  ;;  %2568 = vmatprep.subr.mxu0 %v182_v49  ;;  %v273_v18 = vld [vmem:[%s5482_s1 + $0x370] sm:$0xff]  ;;  %v256_v22 = vld [vmem:[%s5482_s1 + $0x2e8] sm:$0xff]  ;;  %v255_v25 = vld [vmem:[%s5482_s1 + $0x2e0] sm:$0xff]  ;;  %v105_v28 = vmax.f32 %v35_v21, 0.0 }
  0x1c   :  { %2621 = vmatprep.subr.mxu1 %v214_v50  ;;  %2569 = vmatpush3.msra.mxu0 %v166_v51  ;;  %v33_v20 = vld [vmem:[%s5483_s0 + $0x50] sm:$0xff]  ;;  %v240_v24 = vld [vmem:[%s5482_s1 + $0x268] sm:$0xff]  ;;  %v46_v30 = vld [vmem:[%s5483_s0 + $0xb8] sm:$0xff] }
  0x1d   :  { %2622 = vmatpush3.msra.mxu1 %v198_v52  ;;  %2570 = vmatprep.subr.mxu0 %v181_v53  ;;  %v288_v26 = vld [vmem:[%s5482_s1 + $0x3e8] sm:$0xff]  ;;  %v103_v27 = vmax.f32 %v33_v20, 0.0  ;;  %v239_v31 = vld [vmem:[%s5482_s1 + $0x260] sm:$0xff]  ;;  %v254_v33 = vld [vmem:[%s5482_s1 + $0x2d8] sm:$0xff]  ;;  %v116_v40 = vmax.f32 %v46_v30, 0.0 }
  0x1e   :  { %2623 = vmatprep.subr.mxu1 %v213_v54  ;;  %2571 = vmatpush3.msra.mxu0 %v165_v55  ;;  %v44_v29 = vld [vmem:[%s5483_s0 + $0xa8] sm:$0xff]  ;;  %v287_v34 = vld [vmem:[%s5482_s1 + $0x3e0] sm:$0xff]  ;;  %v45_v36 = vld [vmem:[%s5483_s0 + $0xb0] sm:$0xff] }
  0x1f   :  { %2624 = vmatpush3.msra.mxu1 %v197_v56  ;;  %2572 = vmatprep.subr.mxu0 %v180_v57  ;;  %v272_v32 = vld [vmem:[%s5482_s1 + $0x368] sm:$0xff]  ;;  %v43_v35 = vld [vmem:[%s5483_s0 + $0xa0] sm:$0xff]  ;;  %v238_v37 = vld [vmem:[%s5482_s1 + $0x258] sm:$0xff]  ;;  %v114_v39 = vmax.f32 %v44_v29, 0.0  ;;  %v115_v44 = vmax.f32 %v45_v36, 0.0 }
  0x20   :  { %2625 = vmatprep.subr.mxu1 %v212_v59  ;;  %2573 = vmatpush3.msra.mxu0 %v164_v60  ;;  %v271_v38 = vld [vmem:[%s5482_s1 + $0x360] sm:$0xff]  ;;  %v253_v41 = vld [vmem:[%s5482_s1 + $0x2d0] sm:$0xff]  ;;  %v286_v42 = vld [vmem:[%s5482_s1 + $0x3d8] sm:$0xff]  ;;  %v113_v43 = vmax.f32 %v43_v35, 0.0 }
  0x21   :  { %2626 = vmatpush3.msra.mxu1 %v196_v62  ;;  %2574 = vmatprep.subr.mxu0 %v179_v1  ;;  %v54_v45 = vld [vmem:[%s5483_s0 + $0xf8] sm:$0xff]  ;;  %v56_v46 = vld [vmem:[%s5483_s0 + $0x108] sm:$0xff]  ;;  %v237_v47 = vld [vmem:[%s5482_s1 + $0x250] sm:$0xff] }
  0x22   :  { %2627 = vmatprep.subr.mxu1 %v211_v2  ;;  %2575 = vmatpush3.msra.mxu0 %v163_v4  ;;  %v270_v48 = vld [vmem:[%s5482_s1 + $0x358] sm:$0xff]  ;;  %v252_v49 = vld [vmem:[%s5482_s1 + $0x2c8] sm:$0xff]  ;;  %v285_v50 = vld [vmem:[%s5482_s1 + $0x3d0] sm:$0xff]  ;;  %v124_v55 = vmax.f32 %v54_v45, 0.0  ;;  %v126_v56 = vmax.f32 %v56_v46, 0.0 }
  0x23   :  { %387 = vmatprep.mubr.f32.mxu0 %v94_v3  ;;  %2628 = vmatpush3.msra.mxu1 %v195_v6  ;;  %v53_v51 = vld [vmem:[%s5483_s0 + $0xf0] sm:$0xff]  ;;  %v55_v52 = vld [vmem:[%s5483_s0 + $0x100] sm:$0xff]  ;;  %v236_v53 = vld [vmem:[%s5482_s1 + $0x248] sm:$0xff] }
  0x24   :  { %487 = vmatprep.mubr.f32.mxu1 %v96_v5  ;;  %388 = vmatmul.mubr.f32.vlgmr.msra.gmra.mxu0 %v93_v7  ;;  %v269_v54 = vld [vmem:[%s5482_s1 + $0x350] sm:$0xff]  ;;  %v251_v57 = vld [vmem:[%s5482_s1 + $0x2c0] sm:$0xff]  ;;  %v284_v58 = vld [vmem:[%s5482_s1 + $0x3c8] sm:$0xff]  ;;  %v123_v59 = vmax.f32 %v53_v51, 0.0  ;;  %v125_v60 = vmax.f32 %v55_v52, 0.0 }
  0x25   :  { %488 = vmatmul.mubr.f32.vlgmr.msra.gmra.mxu1 %v95_v8  ;;  %2650 = vmatprep.subr.mxu0 %v258_v9  ;;  %v64_v61 = vld [vmem:[%s5483_s0 + $0x148] sm:$0xff]  ;;  %v66_v62 = vld [vmem:[%s5483_s0 + $0x158] sm:$0xff]  ;;  %v235_v63 = vld [vmem:[%s5482_s1 + $0x240] sm:$0xff] }
  0x26   :  { %2703 = vmatprep.subr.mxu1 %v290_v10  ;;  %2651 = vmatpush3.msra.mxu0 %v242_v12  ;;  %v268_v0 = vld [vmem:[%s5482_s1 + $0x348] sm:$0xff]  ;;  %v250_v1 = vld [vmem:[%s5482_s1 + $0x2b8] sm:$0xff]  ;;  %v283_v2 = vld [vmem:[%s5482_s1 + $0x3c0] sm:$0xff]  ;;  %v134_v7 = vmax.f32 %v64_v61, 0.0  ;;  %v136_v8 = vmax.f32 %v66_v62, 0.0 }
  0x27   :  { %2704 = vmatpush3.msra.mxu1 %v274_v13  ;;  %2652 = vmatprep.subr.mxu0 %v257_v15  ;;  %v63_v3 = vld [vmem:[%s5483_s0 + $0x140] sm:$0xff]  ;;  %v65_v4 = vld [vmem:[%s5483_s0 + $0x150] sm:$0xff]  ;;  %v234_v5 = vld [vmem:[%s5482_s1 + $0x238] sm:$0xff] }
  0x28   :  { %2705 = vmatprep.subr.mxu1 %v289_v17  ;;  %2653 = vmatpush3.msra.mxu0 %v241_v16  ;;  %v267_v6 = vld [vmem:[%s5482_s1 + $0x340] sm:$0xff]  ;;  %v249_v9 = vld [vmem:[%s5482_s1 + $0x2b0] sm:$0xff]  ;;  %v282_v10 = vld [vmem:[%s5482_s1 + $0x3b8] sm:$0xff]  ;;  %v133_v11 = vmax.f32 %v63_v3, 0.0  ;;  %v135_v12 = vmax.f32 %v65_v4, 0.0 }
  0x29   :  { %2706 = vmatpush3.msra.mxu1 %v273_v18  ;;  %2654 = vmatprep.subr.mxu0 %v256_v22  ;;  %v74_v13 = vld [vmem:[%s5483_s0 + $0x198] sm:$0xff]  ;;  %v76_v14 = vld [vmem:[%s5483_s0 + $0x1a8] sm:$0xff]  ;;  %v233_v15 = vld [vmem:[%s5482_s1 + $0x230] sm:$0xff] }
  0x2a   :  { %392 = vmatprep.mubr.f32.mxu0 %v104_v19  ;;  %2655 = vmatpush3.msra.mxu0 %v240_v24  ;;  %v266_v16 = vld [vmem:[%s5482_s1 + $0x338] sm:$0xff]  ;;  %v248_v17 = vld [vmem:[%s5482_s1 + $0x2a8] sm:$0xff]  ;;  %v281_v18 = vld [vmem:[%s5482_s1 + $0x3b0] sm:$0xff]  ;;  %v146_v24 = vmax.f32 %v76_v14, 0.0 }
  0x2b   :  { %492 = vmatprep.mubr.f32.mxu1 %v106_v23  ;;  %2656 = vmatprep.subr.mxu0 %v255_v25  ;;  %v73_v19 = vld [vmem:[%s5483_s0 + $0x190] sm:$0xff]  ;;  %v75_v20 = vld [vmem:[%s5483_s0 + $0x1a0] sm:$0xff]  ;;  %v232_v21 = vld [vmem:[%s5482_s1 + $0x228] sm:$0xff]  ;;  %v144_v23 = vmax.f32 %v74_v13, 0.0 }
  0x2c   :  { %2707 = vmatprep.subr.mxu1 %v288_v26  ;;  %393 = vmatmul.mubr.f32.gmra.mxu0 %v103_v27  ;;  %v265_v22 = vld [vmem:[%s5482_s1 + $0x330] sm:$0xff]  ;;  %v247_v25 = vld [vmem:[%s5482_s1 + $0x2a0] sm:$0xff]  ;;  %v280_v26 = vld [vmem:[%s5482_s1 + $0x3a8] sm:$0xff]  ;;  %v143_v27 = vmax.f32 %v73_v19, 0.0 }
  0x2d   :  { %493 = vmatmul.mubr.f32.gmra.mxu1 %v105_v28  ;;  %2657 = vmatpush3.msra.mxu0 %v239_v31  ;;  %v145_v28 = vmax.f32 %v75_v20, 0.0  ;;  %v84_v29 = vld [vmem:[%s5483_s0 + $0x1e8] sm:$0x1]  ;;  %v86_v30 = vld [vmem:[%s5483_s0 + $0x1f8] sm:$0x1]  ;;  %v231_v31 = vld [vmem:[%s5482_s1 + $0x220] sm:$0xff] }
  0x2e   :  { %2708 = vmatpush3.msra.mxu1 %v272_v32  ;;  %2658 = vmatprep.subr.mxu0 %v254_v33  ;;  %v264_v32 = vld [vmem:[%s5482_s1 + $0x328] sm:$0xff]  ;;  %v246_v33 = vld [vmem:[%s5482_s1 + $0x298] sm:$0xff]  ;;  %v83_v35 = vld [vmem:[%s5483_s0 + $0x1e0] sm:$0x1] }
  0x2f   :  { %2709 = vmatprep.subr.mxu1 %v287_v34  ;;  %2659 = vmatpush3.msra.mxu0 %v238_v37  ;;  %v279_v34 = vld [vmem:[%s5482_s1 + $0x3a0] sm:$0xff]  ;;  %v85_v36 = vld [vmem:[%s5483_s0 + $0x1f0] sm:$0x1]  ;;  %v230_v37 = vld [vmem:[%s5482_s1 + $0x218] sm:$0xff] }
  0x30   :  { %2710 = vmatpush3.msra.mxu1 %v271_v38  ;;  %397 = vmatprep.mubr.f32.mxu0 %v114_v39  ;;  %v263_v38 = vld [vmem:[%s5482_s1 + $0x320] sm:$0xff]  ;;  %v154_v39 = vmax.f32 %v84_v29, 0.0  ;;  %v229_v45 = vld [vmem:[%s5482_s1 + $0x210] sm:$0xff]  ;;  %v262_v46 = vld [vmem:[%s5482_s1 + $0x318] sm:$0xff] }
  0x31   :  { %497 = vmatprep.mubr.f32.mxu1 %v116_v40  ;;  %2660 = vmatprep.subr.mxu0 %v253_v41  ;;  %v156_v40 = vmax.f32 %v86_v30, 0.0  ;;  %v245_v41 = vld [vmem:[%s5482_s1 + $0x290] sm:$0xff]  ;;  %v228_v51 = vld [vmem:[%s5482_s1 + $0x208] sm:$0xff]  ;;  %v38_v61 = vld [vmem:[%s5483_s0 + $0x78] sm:$0xff] }
  0x32   :  { %2711 = vmatprep.subr.mxu1 %v286_v42  ;;  %398 = vmatmul.mubr.f32.gmra.mxu0 %v113_v43  ;;  %v278_v42 = vld [vmem:[%s5482_s1 + $0x398] sm:$0xff]  ;;  %v153_v43 = vmax.f32 %v83_v35, 0.0  ;;  %v261_v52 = vld [vmem:[%s5482_s1 + $0x310] sm:$0xff]  ;;  %v275_v62 = vld [vmem:[%s5482_s1 + $0x380] sm:$0xff] }
  0x33   :  { %498 = vmatmul.mubr.f32.gmra.mxu1 %v115_v44  ;;  %2661 = vmatpush3.msra.mxu0 %v237_v47  ;;  %v155_v44 = vmax.f32 %v85_v36, 0.0  ;;  %v28_v47 = vld [vmem:[%s5483_s0 + $0x28] sm:$0xff]  ;;  %v37_v4 = vld [vmem:[%s5483_s0 + $0x70] sm:$0xff]  ;;  %v50_v13 = vld [vmem:[%s5483_s0 + $0xd8] sm:$0xff] }
  0x34   :  { %2712 = vmatpush3.msra.mxu1 %v270_v48  ;;  %2662 = vmatprep.subr.mxu0 %v252_v49  ;;  %v244_v48 = vld [vmem:[%s5482_s1 + $0x288] sm:$0xff]  ;;  %v277_v49 = vld [vmem:[%s5482_s1 + $0x390] sm:$0xff]  ;;  %v319_v20 = vld [vmem:[%s5482_s1 + $0x4e0] sm:$0xff] }
  0x35   :  { %2713 = vmatprep.subr.mxu1 %v285_v50  ;;  %2663 = vmatpush3.msra.mxu0 %v236_v53  ;;  %v27_v50 = vld [vmem:[%s5483_s0 + $0x20] sm:$0xff]  ;;  %v320_v14 = vld [vmem:[%s5482_s1 + $0x4e8] sm:$0xff]  ;;  %v49_v19 = vld [vmem:[%s5483_s0 + $0xd0] sm:$0xff] }
  0x36   :  { %2714 = vmatpush3.msra.mxu1 %v269_v54  ;;  %402 = vmatprep.mubr.f32.mxu0 %v124_v55  ;;  %v243_v53 = vld [vmem:[%s5482_s1 + $0x280] sm:$0xff]  ;;  %v276_v54 = vld [vmem:[%s5482_s1 + $0x388] sm:$0xff]  ;;  %v98_v55 = vmax.f32 %v28_v47, 0.0  ;;  %v302_v29 = vld [vmem:[%s5482_s1 + $0x458] sm:$0xff] }
  0x37   :  { %502 = vmatprep.mubr.f32.mxu1 %v126_v56  ;;  %2664 = vmatprep.subr.mxu0 %v251_v57  ;;  %v30_v56 = vld [vmem:[%s5483_s0 + $0x38] sm:$0xff]  ;;  %v227_v57 = vld [vmem:[%s5482_s1 + $0x200] sm:$0xff]  ;;  %v301_v35 = vld [vmem:[%s5482_s1 + $0x450] sm:$0xff] }
  0x38   :  { %2715 = vmatprep.subr.mxu1 %v284_v58  ;;  %403 = vmatmul.mubr.f32.gmra.mxu0 %v123_v59  ;;  %v97_v58 = vmax.f32 %v27_v50, 0.0  ;;  %v29_v59 = vld [vmem:[%s5483_s0 + $0x30] sm:$0xff] }
  0x39   :  { %503 = vmatmul.mubr.f32.gmra.mxu1 %v125_v60  ;;  %2665 = vmatpush3.msra.mxu0 %v235_v63  ;;  %v260_v60 = vld [vmem:[%s5482_s1 + $0x308] sm:$0xff]  ;;  %v322_v63 = vld [vmem:[%s5482_s1 + $0x4f8] sm:$0xff]  ;;  %v99_v3 = vmax.f32 %v29_v59, 0.0 }
  0x3a   :  { %2716 = vmatpush3.msra.mxu1 %v268_v0  ;;  %2666 = vmatprep.subr.mxu0 %v250_v1  ;;  %v100_v0 = vmax.f32 %v30_v56, 0.0  ;;  %v40_v1 = vld [vmem:[%s5483_s0 + $0x88] sm:$0xff] }
  0x3b   :  { %2717 = vmatprep.subr.mxu1 %v283_v2  ;;  %2667 = vmatpush3.msra.mxu0 %v234_v5  ;;  %v259_v2 = vld [vmem:[%s5482_s1 + $0x300] sm:$0xff]  ;;  %v306_v5 = vld [vmem:[%s5482_s1 + $0x478] sm:$0xff] }
  0x3c   :  { %2718 = vmatpush3.msra.mxu1 %v267_v6  ;;  %407 = vmatprep.mubr.f32.mxu0 %v134_v7  ;;  %v108_v6 = vmax.f32 %v38_v61, 0.0  ;;  %v39_v7 = vld [vmem:[%s5483_s0 + $0x80] sm:$0xff]  ;;  %v4209_v61 = vld [vmem:[%s5484_s5 + $0x18] sm:$0xff] }
  0x3d   :  { %507 = vmatprep.mubr.f32.mxu1 %v136_v8  ;;  %2668 = vmatprep.subr.mxu0 %v249_v9  ;;  %v321_v8 = vld [vmem:[%s5482_s1 + $0x4f0] sm:$0xff]  ;;  %v110_v9 = vmax.f32 %v40_v1, 0.0  ;;  %v87_v1 = vld [vmem:[%s5483_s0 + $0x200] sm:$0x1] }
  0x3e   :  { %2719 = vmatprep.subr.mxu1 %v282_v10  ;;  %408 = vmatmul.mubr.f32.gmra.mxu0 %v133_v11  ;;  %v48_v10 = vld [vmem:[%s5483_s0 + $0xc8] sm:$0xff]  ;;  %v305_v11 = vld [vmem:[%s5482_s1 + $0x470] sm:$0xff] }
  0x3f   :  { %508 = vmatmul.mubr.f32.gmra.mxu1 %v135_v12  ;;  %2669 = vmatpush3.msra.mxu0 %v233_v15  ;;  %v107_v12 = vmax.f32 %v37_v4, 0.0  ;;  %v109_v15 = vmax.f32 %v39_v7, 0.0  ;;  %v90_v4 = vld [vmem:[%s5483_s0 + $0x218] sm:$0x1]  ;;  %v295_v7 = vld [vmem:[%s5482_s1 + $0x420] sm:$0xff] }
  0x40   :  { %2720 = vmatpush3.msra.mxu1 %v266_v16  ;;  %2670 = vmatprep.subr.mxu0 %v248_v17  ;;  %v47_v16 = vld [vmem:[%s5483_s0 + $0xc0] sm:$0xff]  ;;  %v304_v17 = vld [vmem:[%s5482_s1 + $0x468] sm:$0xff] }
  0x41   :  { %2721 = vmatprep.subr.mxu1 %v281_v18  ;;  %2671 = vmatpush3.msra.mxu0 %v232_v21  ;;  %v118_v18 = vmax.f32 %v48_v10, 0.0  ;;  %v120_v21 = vmax.f32 %v50_v13, 0.0  ;;  %v310_v10 = vld [vmem:[%s5482_s1 + $0x498] sm:$0xff] }
  0x42   :  { %2722 = vmatpush3.msra.mxu1 %v265_v22  ;;  %412 = vmatprep.mubr.f32.mxu0 %v144_v23  ;;  %v58_v22 = vld [vmem:[%s5483_s0 + $0x118] sm:$0xff]  ;;  %v303_v23 = vld [vmem:[%s5482_s1 + $0x460] sm:$0xff] }
  0x43   :  { %512 = vmatprep.mubr.f32.mxu1 %v146_v24  ;;  %2672 = vmatprep.subr.mxu0 %v247_v25  ;;  %v117_v24 = vmax.f32 %v47_v16, 0.0  ;;  %v60_v25 = vld [vmem:[%s5483_s0 + $0x128] sm:$0xff]  ;;  %v128_v30 = vmax.f32 %v58_v22, 0.0  ;;  %v293_v16 = vld [vmem:[%s5482_s1 + $0x410] sm:$0xff]  ;;  %v42_v22 = vld [vmem:[%s5483_s0 + $0x98] sm:$0xff] }
  0x44   :  { %2723 = vmatprep.subr.mxu1 %v280_v26  ;;  %413 = vmatmul.mubr.f32.gmra.mxu0 %v143_v27  ;;  %v318_v26 = vld [vmem:[%s5482_s1 + $0x4d8] sm:$0xff]  ;;  %v119_v27 = vmax.f32 %v49_v19, 0.0 }
  0x45   :  { %513 = vmatmul.mubr.f32.gmra.mxu1 %v145_v28  ;;  %2673 = vmatpush3.msra.mxu0 %v231_v31  ;;  %v57_v28 = vld [vmem:[%s5483_s0 + $0x110] sm:$0xff]  ;;  %v59_v31 = vld [vmem:[%s5483_s0 + $0x120] sm:$0xff] }
  0x46   :  { %2724 = vmatpush3.msra.mxu1 %v264_v32  ;;  %2674 = vmatprep.subr.mxu0 %v246_v33  ;;  %v317_v32 = vld [vmem:[%s5482_s1 + $0x4d0] sm:$0xff]  ;;  %v130_v33 = vmax.f32 %v60_v25, 0.0  ;;  %v127_v36 = vmax.f32 %v57_v28, 0.0  ;;  %v291_v25 = vld [vmem:[%s5482_s1 + $0x400] sm:$0xff]  ;;  %v112_v28 = vmax.f32 %v42_v22, 0.0 }
  0x47   :  { %2725 = vmatprep.subr.mxu1 %v279_v34  ;;  %2675 = vmatpush3.msra.mxu0 %v230_v37  ;;  %v68_v34 = vld [vmem:[%s5483_s0 + $0x168] sm:$0xff] }
  0x48   :  { %2726 = vmatpush3.msra.mxu1 %v263_v38  ;;  %417 = vmatprep.mubr.f32.mxu0 %v154_v39  ;;  %v316_v37 = vld [vmem:[%s5482_s1 + $0x4c8] sm:$0xff]  ;;  %v129_v38 = vmax.f32 %v59_v31, 0.0  ;;  %v67_v39 = vld [vmem:[%s5483_s0 + $0x160] sm:$0xff] }
  0x49   :  { %517 = vmatprep.mubr.f32.mxu1 %v156_v40  ;;  %2676 = vmatprep.subr.mxu0 %v245_v41  ;;  %v300_v40 = vld [vmem:[%s5482_s1 + $0x448] sm:$0xff]  ;;  %v138_v41 = vmax.f32 %v68_v34, 0.0  ;;  %v137_v47 = vmax.f32 %v67_v39, 0.0  ;;  %v62_v34 = vld [vmem:[%s5483_s0 + $0x138] sm:$0xff]  ;;  %v4306_v39 = vld [vmem:[%s5484_s5 + $0x20] sm:$0xff] }
  0x4a   :  { %2727 = vmatprep.subr.mxu1 %v278_v42  ;;  %418 = vmatmul.mubr.f32.gmra.mxu0 %v153_v43  ;;  %v70_v42 = vld [vmem:[%s5483_s0 + $0x178] sm:$0xff]  ;;  %v315_v43 = vld [vmem:[%s5482_s1 + $0x4c0] sm:$0xff] }
  0x4b   :  { %518 = vmatmul.mubr.f32.gmra.mxu1 %v155_v44  ;;  %2677 = vmatpush3.msra.mxu0 %v229_v45  ;;  %v69_v44 = vld [vmem:[%s5483_s0 + $0x170] sm:$0xff]  ;;  %v299_v45 = vld [vmem:[%s5482_s1 + $0x440] sm:$0xff]  ;;  %v140_v50 = vmax.f32 %v70_v42, 0.0 }
  0x4c   :  { %2728 = vmatpush3.msra.mxu1 %v262_v46  ;;  %2678 = vmatprep.subr.mxu0 %v244_v48  ;;  %v4176_v46 = vld [vmem:[%s5484_s5 + $0x10] sm:$0xff]  ;;  %v78_v48 = vld [vmem:[%s5483_s0 + $0x1b8] sm:$0xff] }
  0x4d   :  { %2729 = vmatprep.subr.mxu1 %v277_v49  ;;  %2679 = vmatpush3.msra.mxu0 %v228_v51  ;;  %v314_v49 = vld [vmem:[%s5482_s1 + $0x4b8] sm:$0xff]  ;;  %v77_v51 = vld [vmem:[%s5483_s0 + $0x1b0] sm:$0xff]  ;;  %v148_v56 = vmax.f32 %v78_v48, 0.0 }
  0x4e   :  { %2730 = vmatpush3.msra.mxu1 %v261_v52  ;;  %2680 = vmatprep.subr.mxu0 %v243_v53  ;;  %v298_v52 = vld [vmem:[%s5482_s1 + $0x438] sm:$0xff]  ;;  %v139_v53 = vmax.f32 %v69_v44, 0.0  ;;  %v147_v59 = vmax.f32 %v77_v51, 0.0  ;;  %v4319_v44 = vld [vmem:[%s5484_s5 + $0x30] sm:$0x1] }
  0x4f   :  { %2731 = vmatprep.subr.mxu1 %v276_v54  ;;  %2681 = vmatpush3.msra.mxu0 %v227_v57  ;;  %v80_v54 = vld [vmem:[%s5483_s0 + $0x1c8] sm:$0xff]  ;;  %v79_v57 = vld [vmem:[%s5483_s0 + $0x1c0] sm:$0xff] }
  0x50   :  { %587 = vmatprep.mubr.f32.mxu0 %v98_v55  ;;  %2732 = vmatpush3.msra.mxu1 %v260_v60  ;;  %v313_v55 = vld [vmem:[%s5482_s1 + $0x4b0] sm:$0xff]  ;;  %v88_v60 = vld [vmem:[%s5483_s0 + $0x208] sm:$0x1] }
  0x51   :  { %588 = vmatmul.mubr.f32.vlgmr.msra.gmra.mxu0 %v97_v58  ;;  %2733 = vmatprep.subr.mxu1 %v275_v62  ;;  %v297_v58 = vld [vmem:[%s5482_s1 + $0x430] sm:$0xff]  ;;  %v150_v62 = vmax.f32 %v80_v54, 0.0  ;;  %v92_v51 = vld [vmem:[%s5483_s0 + $0x228] sm:$0x1]  ;;  %v91_v54 = vld [vmem:[%s5483_s0 + $0x220] sm:$0x1] }
  0x52   :  { %2756 = vmatprep.subr.mxu0 %v322_v63  ;;  %2734 = vmatpush3.msra.mxu1 %v259_v2  ;;  %v312_v63 = vld [vmem:[%s5482_s1 + $0x4a8] sm:$0xff] }
  0x53   :  { %687 = vmatprep.mubr.f32.mxu1 %v100_v0  ;;  %2757 = vmatpush3.msra.mxu0 %v306_v5  ;;  %v149_v0 = vmax.f32 %v79_v57, 0.0  ;;  %v296_v2 = vld [vmem:[%s5482_s1 + $0x428] sm:$0xff]  ;;  %v311_v5 = vld [vmem:[%s5482_s1 + $0x4a0] sm:$0xff]  ;;  %v3556_v57 = vmov 4  }
  0x54   :  { %688 = vmatmul.mubr.f32.vlgmr.msra.gmra.mxu1 %v99_v3  ;;  %2758 = vmatprep.subr.mxu0 %v321_v8  ;;  %v158_v3 = vmax.f32 %v88_v60, 0.0  ;;  %v4236_v8 = vld [vmem:[%s5484_s5 + $0x28] sm:$0xff]  ;;  %v3559_v60 = vmov 8  }
  0x55   :  { %592 = vmatprep.mubr.f32.mxu0 %v108_v6  ;;  %2759 = vmatpush3.msra.mxu0 %v305_v11  ;;  %v89_v6 = vld [vmem:[%s5483_s0 + $0x210] sm:$0x1]  ;;  %v160_v11 = vmax.f32 %v90_v4, 0.0 }
  0x56   :  { %692 = vmatprep.mubr.f32.mxu1 %v110_v9  ;;  %593 = vmatmul.mubr.f32.gmra.mxu0 %v107_v12  ;;  %v157_v9 = vmax.f32 %v87_v1, 0.0  ;;  %v294_v12 = vld [vmem:[%s5482_s1 + $0x418] sm:$0xff]  ;;  %v159_v13 = vmax.f32 %v89_v6, 0.0  ;;  %v979_v1 = vld [vmem:[%s5485_s4 + $0x68] sm:$0xff] }
  0x57   :  { %2760 = vmatprep.subr.mxu0 %v320_v14  ;;  %597 = vmatprep.mubr.f32.mxu0 %v118_v18  ;;  %v32_v14 = vld [vmem:[%s5483_s0 + $0x48] sm:$0xff]  ;;  %v4260_v18 = vld [vmem:[%s5484_s5] sm:$0xff] }
  0x58   :  { %2761 = vmatpush3.msra.mxu0 %v304_v17  ;;  %693 = vmatmul.mubr.f32.gmra.mxu1 %v109_v15  ;;  %v309_v15 = vld [vmem:[%s5482_s1 + $0x490] sm:$0xff]  ;;  %v308_v17 = vld [vmem:[%s5482_s1 + $0x488] sm:$0xff]  ;;  %v102_v19 = vmax.f32 %v32_v14, 0.0 }
  0x59   :  { %2762 = vmatprep.subr.mxu0 %v319_v20  ;;  %697 = vmatprep.mubr.f32.mxu1 %v120_v21  ;;  %v31_v20 = vld [vmem:[%s5483_s0 + $0x40] sm:$0xff]  ;;  %v292_v21 = vld [vmem:[%s5482_s1 + $0x408] sm:$0xff] }
  0x5a   :  { %2763 = vmatpush3.msra.mxu0 %v303_v23  ;;  %998 = vperm.xlu1 %3505, %v4176_v46   ;;  %v3552_v23 = vmov 0  }
  0x5b   :  { %598 = vmatmul.mubr.f32.gmra.mxu0 %v117_v24  ;;  %2764 = vmatprep.subr.mxu0 %v318_v26  ;;  %v307_v24 = vld [vmem:[%s5482_s1 + $0x480] sm:$0xff]  ;;  %v101_v26 = vmax.f32 %v31_v20, 0.0  ;;  %v973_v20 = vld [vmem:[%s5485_s4 + $0x38] sm:$0xff] }
  0x5c   :  { %2765 = vmatpush3.msra.mxu0 %v302_v29  ;;  %698 = vmatmul.mubr.f32.gmra.mxu1 %v119_v27  ;;  %v4282_v27 = vld [vmem:[%s5484_s5 + $0x8] sm:$0xff]  ;;  %v41_v29 = vld [vmem:[%s5483_s0 + $0x90] sm:$0xff] }
  0x5d   :  { %2766 = vmatprep.subr.mxu0 %v317_v32  ;;  %602 = vmatprep.mubr.f32.mxu0 %v128_v30  ;;  %v52_v30 = vld [vmem:[%s5483_s0 + $0xe8] sm:$0xff]  ;;  %v111_v31 = vmax.f32 %v41_v29, 0.0 }
  0x5e   :  { %2767 = vmatpush3.msra.mxu0 %v301_v35  ;;  %702 = vmatprep.mubr.f32.mxu1 %v130_v33  ;;  %v122_v32 = vmax.f32 %v52_v30, 0.0  ;;  %v51_v33 = vld [vmem:[%s5483_s0 + $0xe0] sm:$0xff]  ;;  %v3553_v35 = vmov 2   ;;  %v971_v29 = vld [vmem:[%s5485_s4 + $0x28] sm:$0xff] }
  0x5f   :  { %603 = vmatmul.mubr.f32.gmra.mxu0 %v127_v36  ;;  %2768 = vmatprep.subr.mxu0 %v316_v37  ;;  %v121_v36 = vmax.f32 %v51_v33, 0.0  ;;  %v132_v37 = vmax.f32 %v62_v34, 0.0  ;;  %v2428_v30 = vld [vmem:[%s5485_s4 + $0xe0] sm:$0xff]  ;;  %v2427_v34 = vld [vmem:[%s5485_s4 + $0xd8] sm:$0xff] }
  0x60   :  { %2769 = vmatpush3.msra.mxu0 %v300_v40  ;;  %703 = vmatmul.mubr.f32.gmra.mxu1 %v129_v38  ;;  %v61_v38 = vld [vmem:[%s5483_s0 + $0x130] sm:$0xff]  ;;  %v72_v40 = vld [vmem:[%s5483_s0 + $0x188] sm:$0xff] }
  0x61   :  { %2770 = vmatprep.subr.mxu0 %v315_v43  ;;  %607 = vmatprep.mubr.f32.mxu0 %v138_v41  ;;  %v131_v41 = vmax.f32 %v61_v38, 0.0  ;;  %v142_v42 = vmax.f32 %v72_v40, 0.0  ;;  %v71_v43 = vld [vmem:[%s5483_s0 + $0x180] sm:$0xff]  ;;  %v2426_v38 = vld [vmem:[%s5485_s4 + $0xd0] sm:$0xff] }
  0x62   :  { %2771 = vmatpush3.msra.mxu0 %v299_v45  ;;  %707 = vmatprep.mubr.f32.mxu1 %v140_v50  ;;  %v82_v45 = vld [vmem:[%s5483_s0 + $0x1d8] sm:$0xff]  ;;  %v141_v48 = vmax.f32 %v71_v43, 0.0  ;;  %v81_v50 = vld [vmem:[%s5483_s0 + $0x1d0] sm:$0xff] }
  0x63   :  { %608 = vmatmul.mubr.f32.gmra.mxu0 %v137_v47  ;;  %2772 = vmatprep.subr.mxu0 %v314_v49  ;;  %v5489_v47 = vmov 0.0   ;;  %v152_v49 = vmax.f32 %v82_v45, 0.0  ;;  %v968_v40 = vld [vmem:[%s5485_s4 + $0x10] sm:$0xff] }
  0x64   :  { %2773 = vmatpush3.msra.mxu0 %v298_v52  ;;  %708 = vmatmul.mubr.f32.gmra.mxu1 %v139_v53  ;;  %901 = vst [vmem:[#allocation2] sm:$0xff] %v5489_v47  ;;  %902 = vst [vmem:[#allocation2 + $0x39] sm:$0xff] %v5489_v47  ;;  %v151_v52 = vmax.f32 %v81_v50, 0.0  ;;  %v162_v53 = vmax.f32 %v92_v51, 0.0 }
  0x65   :  { %2774 = vmatprep.subr.mxu0 %v313_v55  ;;  %612 = vmatprep.mubr.f32.mxu0 %v148_v56  ;;  %v161_v55 = vmax.f32 %v91_v54, 0.0  ;;  %v3555_v56 = vmov 3  }
  0x66   :  { %2775 = vmatpush3.msra.mxu0 %v297_v58  ;;  %1002 = vperm.xlu1 %3505, %v4209_v61   ;;  %v3557_v58 = vmov 5  }
  0x67   :  { %613 = vmatmul.mubr.f32.gmra.mxu0 %v147_v59  ;;  %2776 = vmatprep.subr.mxu0 %v312_v63  ;;  %v3558_v59 = vmov 6   ;;  %v981_v63 = vld [vmem:[%s5485_s4 + $0x78] sm:$0xff] }
  0x68   :  { %712 = vmatprep.mubr.f32.mxu1 %v150_v62  ;;  %2777 = vmatpush3.msra.mxu0 %v296_v2  ;;  %v3560_v62 = vmov 7  }
  0x69   :  { %713 = vmatmul.mubr.f32.gmra.mxu1 %v149_v0  ;;  %2778 = vmatprep.subr.mxu0 %v311_v5  ;;  %v980_v0 = vld [vmem:[%s5485_s4 + $0x70] sm:$0xff] }
  0x6a   :  { %617 = vmatprep.mubr.f32.mxu0 %v158_v3  ;;  %2779 = vmatpush3.msra.mxu0 %v295_v7  ;;  %v978_v3 = vld [vmem:[%s5485_s4 + $0x60] sm:$0xff]  ;;  %v977_v7 = vld [vmem:[%s5485_s4 + $0x58] sm:$0xff] }
  0x6b   :  { %1010 = vperm.xlu1 %3505, %v4236_v8   ;;  %618 = vmatmul.mubr.f32.gmra.mxu0 %v157_v9  ;;  %v976_v9 = vld [vmem:[%s5485_s4 + $0x50] sm:$0xff] }
  0x6c   :  { %2780 = vmatprep.subr.mxu0 %v310_v10  ;;  %717 = vmatprep.mubr.f32.mxu1 %v160_v11  ;;  %v975_v11 = vld [vmem:[%s5485_s4 + $0x48] sm:$0xff] }
  0x6d   :  { %2781 = vmatpush3.msra.mxu0 %v294_v12  ;;  %718 = vmatmul.mubr.f32.gmra.mxu1 %v159_v13 }
  0x6e   :  { %2782 = vmatprep.subr.mxu0 %v309_v15  ;;  %787 = vmatprep.mubr.f32.mxu0 %v102_v19  ;;  %v974_v15 = vld [vmem:[%s5485_s4 + $0x40] sm:$0xff]  ;;  %v2431_v19 = vld [vmem:[%s5485_s4 + $0xf8] sm:$0xff] }
  0x6f   :  { %2783 = vmatpush3.msra.mxu0 %v293_v16  ;;  %3506 = vset.pattern.permute.xlu1 %v3552_v23 }
  0x70   :  { %2784 = vmatprep.subr.mxu0 %v308_v17  ;;  %926 = vperm.xlu1 %3506, %v4260_v18  }
  0x71   :  { %2785 = vmatpush3.msra.mxu0 %v292_v21  ;;  %990 = vperm.xlu0 %3504, %v4260_v18  }
  0x72   :  { %2786 = vmatprep.subr.mxu0 %v307_v24  ;;  %3016 = vmatprep.subr.mxu1 %v5489_v47 }
  0x73   :  { %2787 = vmatpush3.msra.mxu0 %v291_v25  ;;  %3017 = vmatpush3.msra.mxu1 %v2431_v19 }
  0x74   :  { %788 = vmatmul.mubr.f32.vlgmr.msra.gmra.mxu0 %v101_v26  ;;  %931 = vperm.xlu1 %3506, %v4282_v27  }
  0x75   :  { %792 = vmatprep.mubr.f32.mxu0 %v112_v28  ;;  %994 = vperm.xlu0 %3504, %v4282_v27   ;;  %v2429_v28 = vld [vmem:[%s5485_s4 + $0xe8] sm:$0xff] }
  0x76   :  { %3069 = vmatprep.subr.mxu0 %v5489_v47  ;;  %3018 = vmatprep.subr.mxu1 %v5489_v47 }
  0x77   :  { %3070 = vmatpush3.msra.mxu0 %v981_v63  ;;  %v2462_v63 = vld [vmem:[%s5485_s4 + $0x1f0] sm:$0xff]  ;;  %3048 = vmatprep.mubr.msk.f32.mxu1 %vm3561_vm0, %v5489_v47 }
  0x78   :  { %793 = vmatmul.mubr.f32.gmra.mxu0 %v111_v31  ;;  %3508 = vset.pattern.permute.xlu1 %v3553_v35  ;;  %v970_v31 = vld [vmem:[%s5485_s4 + $0x20] sm:$0xff] }
  0x79   :  { %1253 = vperm.xlu1 %3508, %v4282_v27   ;;  %797 = vmatprep.mubr.f32.mxu0 %v122_v32 }
  0x7a   :  { %1006 = vperm.xlu0 %3504, %v4306_v39   ;;  %3071 = vmatprep.subr.mxu0 %v5489_v47 }
  0x7b   :  { %3072 = vmatpush3.msra.mxu0 %v980_v0 }
  0x7c   :  { %798 = vmatmul.mubr.f32.gmra.mxu0 %v121_v36  ;;  %3073 = vmatprep.subr.mxu0 %v5489_v47 }
  0x7d   :  { %1257 = vperm.xlu1 %3508, %v4176_v46   ;;  %802 = vmatprep.mubr.f32.mxu0 %v132_v37 }
  0x7e   :  { %1014 = vperm.xlu0 %3504, %v4319_v44   ;;  %3074 = vmatpush3.msra.mxu0 %v979_v1  ;;  %v2419_v1 = vld [vmem:[%s5485_s4 + $0x98] sm:$0xff] }
  0x7f   :  { %3075 = vmatprep.subr.mxu0 %v5489_v47 }
  0x80   :  { %803 = vmatmul.mubr.f32.gmra.mxu0 %v131_v41  ;;  %v2425_v41 = vld [vmem:[%s5485_s4 + $0xc8] sm:$0xff] }
  0x81   :  { %3510 = vset.pattern.permute.xlu1 %v3552_v23  ;;  %807 = vmatprep.mubr.f32.mxu0 %v142_v42  ;;  %v967_v42 = vld [vmem:[%s5485_s4 + $0x8] sm:$0xff] }
  0x82   :  { %941 = vperm.xlu1 %3510, %v4209_v61   ;;  %3507 = vset.pattern.permute.xlu0 %v3553_v35 }
  0x83   :  { %1249 = vperm.xlu0 %3507, %v4260_v18   ;;  %3076 = vmatpush3.msra.mxu0 %v978_v3  ;;  %v2461_v3 = vld [vmem:[%s5485_s4 + $0x1e8] sm:$0xff] }
  0x84   :  { %808 = vmatmul.mubr.f32.gmra.mxu0 %v141_v48  ;;  %3077 = vmatprep.subr.mxu0 %v5489_v47  ;;  %v2424_v48 = vld [vmem:[%s5485_s4 + $0xc0] sm:$0xff] }
  0x85   :  { %812 = vmatprep.mubr.f32.mxu0 %v152_v49  ;;  %3078 = vmatpush3.msra.mxu0 %v977_v7  ;;  %v966_v49 = vld [vmem:[%s5485_s4] sm:$0xff]  ;;  %v2417_v7 = vld [vmem:[%s5485_s4 + $0x88] sm:$0xff] }
  0x86   :  { %946 = vperm.xlu1 %3510, %v4306_v39   ;;  %3079 = vmatprep.subr.mxu0 %v5489_v47 }
  0x87   :  { %3509 = vset.pattern.permute.xlu0 %v3552_v23  ;;  %3080 = vmatpush3.msra.mxu0 %v976_v9  ;;  %v2460_v9 = vld [vmem:[%s5485_s4 + $0x1e0] sm:$0xff] }
  0x88   :  { %813 = vmatmul.mubr.f32.gmra.mxu0 %v151_v52  ;;  %936 = vperm.xlu0 %3509, %v4176_v46  }
  0x89   :  { %817 = vmatprep.mubr.f32.mxu0 %v162_v53  ;;  %3081 = vmatprep.subr.mxu0 %v5489_v47  ;;  %v2423_v53 = vld [vmem:[%s5485_s4 + $0xb8] sm:$0xff] }
  0x8a   :  { %3512 = vset.pattern.permute.xlu1 %v3553_v35  ;;  %3082 = vmatpush3.msra.mxu0 %v975_v11 }
  0x8b   :  { %1265 = vperm.xlu1 %3512, %v4306_v39   ;;  %3083 = vmatprep.subr.mxu0 %v5489_v47 }
  0x8c   :  { %818 = vmatmul.mubr.f32.gmra.mxu0 %v161_v55  ;;  %3511 = vset.pattern.permute.xlu0 %v3553_v35  ;;  %v2463_v55 = vld [vmem:[%s5485_s4 + $0x1f8] sm:$0xff] }
  0x8d   :  { %1261 = vperm.xlu0 %3511, %v4209_v61   ;;  %3084 = vmatpush3.msra.mxu0 %v974_v15  ;;  %v2416_v15 = vld [vmem:[%s5485_s4 + $0x80] sm:$0xff] }
  0x8e   :  { %3085 = vmatprep.subr.mxu0 %v5489_v47  ;;  %3101 = vmatprep.mubr.msk.f32.mxu0 %vm3561_vm0, %v5489_v47 }
  0x8f   :  { %1269 = vperm.xlu1 %3512, %v4236_v8   ;;  %3086 = vmatpush3.msra.mxu0 %v973_v20  ;;  %v2459_v20 = vld [vmem:[%s5485_s4 + $0x1d8] sm:$0xff] }
  0x90   :  { %3087 = vmatprep.subr.mxu0 %v5489_v47 }
  0x91   :  { %3513 = vset.pattern.permute.xlu0 %v3552_v23 }
  0x92   :  { %951 = vperm.xlu0 %3513, %v4236_v8  }
  0x93   :  { %3514 = vset.pattern.permute.xlu1 %v3552_v23  ;;  %v972_v23 = vld [vmem:[%s5485_s4 + $0x30] sm:$0xff] }
  0x94   :  { %956 = vperm.xlu1 %3514, %v4319_v44   ;;  %3088 = vmatpush3.msra.mxu0 %v972_v23 }
  0x95   :  { %3089 = vmatprep.subr.mxu0 %v5489_v47 }
  0x96   :  { %3515 = vset.pattern.permute.xlu0 %v3553_v35  ;;  %3090 = vmatpush3.msra.mxu0 %v971_v29  ;;  %v969_v35 = vld [vmem:[%s5485_s4 + $0x18] sm:$0xff] }
  0x97   :  { %1273 = vperm.xlu0 %3515, %v4319_v44   ;;  %3091 = vmatprep.subr.mxu0 %v5489_v47 }
  0x98   :  { %3516 = vset.pattern.permute.xlu1 %v3555_v56  ;;  %3092 = vmatpush3.msra.mxu0 %v970_v31 }
  0x99   :  { %1415 = vperm.xlu1 %3516, %v4260_v18   ;;  %3093 = vmatprep.subr.mxu0 %v5489_v47 }
  0x9a   :  { %3094 = vmatpush3.msra.mxu0 %v969_v35 }
  0x9b   :  { %3518 = vset.pattern.permute.xlu0 %v3555_v56  ;;  %3095 = vmatprep.subr.mxu0 %v5489_v47 }
  0x9c   :  { %1419 = vperm.xlu0 %3518, %v4282_v27   ;;  %3096 = vmatpush3.msra.mxu0 %v968_v40  ;;  %v2454_v40 = vld [vmem:[%s5485_s4 + $0x1b0] sm:$0xff] }
  0x9d   :  { %3517 = vset.pattern.permute.xlu1 %v3556_v57  ;;  %3097 = vmatprep.subr.mxu0 %v5489_v47 }
  0x9e   :  { %1581 = vperm.xlu1 %3517, %v4260_v18   ;;  %3098 = vmatpush3.msra.mxu0 %v967_v42  ;;  %v2453_v42 = vld [vmem:[%s5485_s4 + $0x1a8] sm:$0xff] }
  0x9f   :  { %3099 = vmatprep.subr.mxu0 %v5489_v47 }
  0xa0   :  { %1431 = vperm.xlu0 %3518, %v4306_v39   ;;  %3100 = vmatpush3.msra.mxu0 %v966_v49  ;;  %v2452_v49 = vld [vmem:[%s5485_s4 + $0x1a0] sm:$0xff] }
  0xa1   :  { %3175 = vmatprep.subr.mxu0 %v5489_v47 }
  0xa2   :  { %1585 = vperm.xlu1 %3517, %v4282_v27  }
  0xa4   :  { %3521 = vset.pattern.permute.xlu0 %v3556_v57 }
  0xa5   :  { %1589 = vperm.xlu0 %3521, %v4176_v46  }
  0xa6   :  { %3519 = vset.pattern.permute.xlu1 %v3555_v56 }
  0xa7   :  { %1423 = vperm.xlu1 %3519, %v4176_v46  }
  0xa9   :  { %1601 = vperm.xlu0 %3521, %v4236_v8  }
  0xab   :  { %1427 = vperm.xlu1 %3519, %v4209_v61  }
  0xad   :  { %3524 = vset.pattern.permute.xlu0 %v3557_v58 }
  0xae   :  { %1747 = vperm.xlu0 %3524, %v4260_v18  }
  0xaf   :  { %3520 = vset.pattern.permute.xlu1 %v3556_v57 }
  0xb0   :  { %1593 = vperm.xlu1 %3520, %v4209_v61  }
  0xb2   :  { %3527 = vset.pattern.permute.xlu0 %v3558_v59 }
  0xb3   :  { %1917 = vperm.xlu0 %3527, %v4282_v27  }
  0xb4   :  { %1597 = vperm.xlu1 %3520, %v4306_v39  }
  0xb7   :  { %1929 = vperm.xlu0 %3527, %v4306_v39  }
  0xb8   :  { %3522 = vset.pattern.permute.xlu1 %v3555_v56 }
  0xb9   :  { %1435 = vperm.xlu1 %3522, %v4236_v8  }
  0xbb   :  { %3530 = vset.pattern.permute.xlu0 %v3557_v58 }
  0xbc   :  { %1759 = vperm.xlu0 %3530, %v4209_v61  }
  0xbd   :  { %1439 = vperm.xlu1 %3522, %v4319_v44  }
  0xc0   :  { %1771 = vperm.xlu0 %3530, %v4319_v44  }
  0xc1   :  { %3523 = vset.pattern.permute.xlu1 %v3556_v57  ;;  %v2421_v57 = vld [vmem:[%s5485_s4 + $0xa8] sm:$0xff] }
  0xc2   :  { %1605 = vperm.xlu1 %3523, %v4319_v44  }
  0xc4   :  { %3533 = vset.pattern.permute.xlu0 %v3559_v60 }
  0xc5   :  { %2245 = vperm.xlu0 %3533, %v4260_v18  }
  0xc6   :  { %3525 = vset.pattern.permute.xlu1 %v3558_v59 }
  0xc7   :  { %1913 = vperm.xlu1 %3525, %v4260_v18  }
  0xc9   :  { %3535 = vset.pattern.permute.xlu0 %v3560_v62 }
  0xca   :  { %2087 = vperm.xlu0 %3535, %v4176_v46  }
  0xcb   :  { %3526 = vset.pattern.permute.xlu1 %v3557_v58 }
  0xcc   :  { %1751 = vperm.xlu1 %3526, %v4282_v27  }
  0xce   :  { %3537 = vset.pattern.permute.xlu0 %v3559_v60 }
  0xcf   :  { %2257 = vperm.xlu0 %3537, %v4209_v61  }
  0xd0   :  { %1755 = vperm.xlu1 %3526, %v4176_v46  }
  0xd3   :  { %3539 = vset.pattern.permute.xlu0 %v3560_v62 }
  0xd4   :  { %3528 = vset.pattern.permute.xlu1 %v3558_v59  ;;  %2099 = vperm.xlu0 %3539, %v4236_v8  }
  0xd5   :  { %1921 = vperm.xlu1 %3528, %v4176_v46   ;;  %v4427_v14 = vpop.permute.xlu1 %998 }
  0xd8   :  { %3541 = vset.pattern.permute.xlu0 %v3559_v60 }
  0xd9   :  { %1925 = vperm.xlu1 %3528, %v4209_v61   ;;  %2269 = vperm.xlu0 %3541, %v4319_v44  }
  0xdd   :  { %3529 = vset.pattern.permute.xlu1 %v3557_v58 }
  0xde   :  { %1763 = vperm.xlu1 %3529, %v4306_v39  }
  0xe1   :  { %v4459_v24 = vpop.permute.xlu1 %1002 }
  0xe2   :  { %1767 = vperm.xlu1 %3529, %v4236_v8  }
  0xe4   :  { %v2576_v2 = vpop.f32.mrf.mxu0 }
  0xe5   :  { %v4404_v4 = vpop.f32.mrf.mxu1 }
  0xe6   :  { %3531 = vset.pattern.permute.xlu1 %v3558_v59  ;;  %v2577_v5 = vpop.f32.mrf.mxu0  ;;  %v4493_v36 = vpop.permute.xlu1 %1010  ;;  %v2420_v59 = vld [vmem:[%s5485_s4 + $0xa0] sm:$0xff] }
  0xe7   :  { %1933 = vperm.xlu1 %3531, %v4236_v8   ;;  %v4406_v6 = vadd.f32 %v2577_v5, %v2576_v2  ;;  %v4417_v10 = vpop.f32.mrf.mxu1  ;;  %5491 = vst [vmem:[#allocation3_spill] sm:$0xff] %v4493_v36 }
  0xeb   :  { %1937 = vperm.xlu1 %3531, %v4319_v44  }
  0xec   :  { %v4423_v12 = vpop.f32.mrf.mxu0 }
  0xed   :  { %v4425_v13 = vpop.f32.mrf.mxu1 }
  0xee   :  { %v4434_v16 = vpop.f32.mrf.mxu0 }
  0xef   :  { %3532 = vset.pattern.permute.xlu1 %v3560_v62  ;;  %v4436_v17 = vpop.f32.mrf.mxu1 }
  0xf0   :  { %2079 = vperm.xlu1 %3532, %v4260_v18   ;;  %v2430_v18 = vld [vmem:[%s5485_s4 + $0xf0] sm:$0xff] }
  0xf1   :  { %3019 = vmatpush3.msra.mxu1 %v2430_v18 }
  0xf2   :  { %v4448_v21 = vpop.f32.mrf.mxu0  ;;  %3020 = vmatprep.subr.mxu1 %v5489_v47 }
  0xf3   :  { %v4450_v22 = vpop.f32.mrf.mxu1  ;;  %3021 = vmatpush3.msra.mxu1 %v2429_v28  ;;  %v2457_v28 = vld [vmem:[%s5485_s4 + $0x1c8] sm:$0xff] }
  0xf4   :  { %2083 = vperm.xlu1 %3532, %v4282_v27   ;;  %v4461_v25 = vpop.f32.mrf.mxu0  ;;  %3022 = vmatprep.subr.mxu1 %v5489_v47 }
  0xf5   :  { %v4463_v26 = vpop.f32.mrf.mxu1  ;;  %3023 = vmatpush3.msra.mxu1 %v2428_v30  ;;  %v2456_v30 = vld [vmem:[%s5485_s4 + $0x1c0] sm:$0xff] }
  0xf6   :  { %3024 = vmatprep.subr.mxu1 %v5489_v47 }
  0xf7   :  { %3025 = vmatpush3.msra.mxu1 %v2427_v34  ;;  %v2455_v34 = vld [vmem:[%s5485_s4 + $0x1b8] sm:$0xff] }
  0xf8   :  { %3534 = vset.pattern.permute.xlu1 %v3559_v60  ;;  %v4483_v32 = vpop.f32.mrf.mxu0  ;;  %3026 = vmatprep.subr.mxu1 %v5489_v47 }
  0xf9   :  { %2249 = vperm.xlu1 %3534, %v4282_v27   ;;  %v4485_v33 = vpop.f32.mrf.mxu1  ;;  %3027 = vmatpush3.msra.mxu1 %v2426_v38 }
  0xfa   :  { %v4496_v37 = vpop.f32.mrf.mxu0  ;;  %3028 = vmatprep.subr.mxu1 %v5489_v47 }
  0xfb   :  { %v4498_v27 = vpop.f32.mrf.mxu1  ;;  %3029 = vmatpush3.msra.mxu1 %v2425_v41 }
  0xfc   :  { %3030 = vmatprep.subr.mxu1 %v5489_v47 }
  0xfd   :  { %2253 = vperm.xlu1 %3534, %v4176_v46   ;;  %v927_v46 = vpop.permute.xlu1 %926  ;;  %3031 = vmatpush3.msra.mxu1 %v2424_v48 }
  0xfe   :  { %v4516_v43 = vpop.f32.mrf.mxu0  ;;  %v959_v50 = vmul.f32 0.0, %v927_v46  ;;  %3032 = vmatprep.subr.mxu1 %v5489_v47 }
  0xff   :  { %v4518_v45 = vpop.f32.mrf.mxu1  ;;  %3033 = vmatpush3.msra.mxu1 %v2423_v53  ;;  %v2451_v53 = vld [vmem:[%s5485_s4 + $0x198] sm:$0xff] }
 0x100   :  { %v4529_v51 = vpop.f32.mrf.mxu0  ;;  %3102 = vmatmul.mubr.f32.vlgmr.msra.gmra.mxu0 %v959_v50  ;;  %3034 = vmatprep.subr.mxu1 %v5489_v47 }
 0x101   :  { %3536 = vset.pattern.permute.xlu1 %v3560_v62  ;;  %v4533_v52 = vpop.f32.mrf.mxu1  ;;  %3176 = vmatpush3.msra.mxu0 %v2463_v55 }
 0x102   :  { %2091 = vperm.xlu1 %3536, %v4209_v61   ;;  %v2422_v61 = vld [vmem:[%s5485_s4 + $0xb0] sm:$0xff]  ;;  %3177 = vmatprep.subr.mxu0 %v5489_v47 }
 0x103   :  { %3035 = vmatpush3.msra.mxu1 %v2422_v61  ;;  %3178 = vmatpush3.msra.mxu0 %v2462_v63  ;;  %v2449_v63 = vld [vmem:[%s5485_s4 + $0x188] sm:$0xff] }
 0x104   :  { %v4545_v54 = vpop.f32.mrf.mxu0  ;;  %3036 = vmatprep.subr.mxu1 %v5489_v47  ;;  %3179 = vmatprep.subr.mxu0 %v5489_v47 }
 0x105   :  { %v4551_v56 = vpop.f32.mrf.mxu1  ;;  %3037 = vmatpush3.msra.mxu1 %v2421_v57  ;;  %3180 = vmatpush3.msra.mxu0 %v2461_v3  ;;  %v2450_v57 = vld [vmem:[%s5485_s4 + $0x190] sm:$0xff]  ;;  %v2448_v3 = vld [vmem:[%s5485_s4 + $0x180] sm:$0xff] }
 0x106   :  { %2095 = vperm.xlu1 %3536, %v4306_v39   ;;  %v4557_v58 = vpop.f32.mrf.mxu0  ;;  %3038 = vmatprep.subr.mxu1 %v5489_v47 }
 0x107   :  { %v4569_v0 = vpop.f32.mrf.mxu1  ;;  %3039 = vmatpush3.msra.mxu1 %v2420_v59  ;;  %3181 = vmatprep.subr.mxu0 %v5489_v47 }
 0x108   :  { %3040 = vmatprep.subr.mxu1 %v5489_v47  ;;  %3182 = vmatpush3.msra.mxu0 %v2460_v9 }
 0x109   :  { %3041 = vmatpush3.msra.mxu1 %v2419_v1  ;;  %3104 = vmatprep.mubr.msk.f32.mxu0 %vm3561_vm0, %v5489_v47 }
 0x10a   :  { %3538 = vset.pattern.permute.xlu1 %v3559_v60  ;;  %v4576_v2 = vpop.f32.mrf.mxu0  ;;  %v2418_v60 = vld [vmem:[%s5485_s4 + $0x90] sm:$0xff]  ;;  %3042 = vmatprep.subr.mxu1 %v5489_v47 }
 0x10b   :  { %2261 = vperm.xlu1 %3538, %v4306_v39   ;;  %v4588_v39 = vpop.f32.mrf.mxu1  ;;  %3043 = vmatpush3.msra.mxu1 %v2418_v60 }
 0x10c   :  { %v4585_v5 = vpop.f32.mrf.mxu0  ;;  %3044 = vmatprep.subr.mxu1 %v5489_v47  ;;  %3183 = vmatprep.subr.mxu0 %v5489_v47 }
 0x10d   :  { %3045 = vmatpush3.msra.mxu1 %v2417_v7  ;;  %v4605_v19 = vpop.f32.mrf.mxu1  ;;  %3184 = vmatpush3.msra.mxu0 %v2459_v20 }
 0x10e   :  { %3046 = vmatprep.subr.mxu1 %v5489_v47  ;;  %3185 = vmatprep.subr.mxu0 %v5489_v47 }
 0x10f   :  { %2265 = vperm.xlu1 %3538, %v4236_v8   ;;  %3047 = vmatpush3.msra.mxu1 %v2416_v15 }
 0x110   :  { %3122 = vmatprep.subr.mxu1 %v5489_v47 }
 0x111   :  { %v4600_v11 = vpop.f32.mrf.mxu0 }
 0x113   :  { %v4610_v8 = vpop.f32.mrf.mxu0  ;;  %3540 = vset.pattern.permute.xlu1 %v3560_v62  ;;  %v2458_v62 = vld [vmem:[%s5485_s4 + $0x1d0] sm:$0xff] }
 0x114   :  { %v4616_v18 = vpop.f32.mrf.mxu1  ;;  %2103 = vperm.xlu1 %3540, %v4319_v44   ;;  %3186 = vmatpush3.msra.mxu0 %v2458_v62 }
 0x115   :  { %3187 = vmatprep.subr.mxu0 %v5489_v47 }
 0x116   :  { %v2685_v23 = vpop.f32.mrf.mxu0  ;;  %v4630_v44 = vpop.f32.mrf.mxu1  ;;  %3188 = vmatpush3.msra.mxu0 %v2457_v28 }
 0x117   :  { %3189 = vmatprep.subr.mxu0 %v5489_v47 }
 0x118   :  { %v2686_v29 = vpop.f32.mrf.mxu0  ;;  %v4640_v35 = vpop.f32.mrf.mxu1  ;;  %3190 = vmatpush3.msra.mxu0 %v2456_v30 }
 0x119   :  { %3191 = vmatprep.subr.mxu0 %v5489_v47 }
 0x11a   :  { %3192 = vmatpush3.msra.mxu0 %v2455_v34  ;;  %v2739_v46 = vpop.f32.mrf.mxu1  ;;  %v2581_v34 = vadd.f32 %v4434_v16, %v4423_v12  ;;  %v2684_v12 = vadd.f32 %v4610_v8, %v4600_v11 }
 0x11b   :  { %v2688_v31 = vpop.f32.mrf.mxu0  ;;  %3193 = vmatprep.subr.mxu0 %v5489_v47  ;;  %v2740_v11 = vadd.f32 %v2739_v46, %v4640_v35 }
 0x11c   :  { %3194 = vmatpush3.msra.mxu0 %v2454_v40  ;;  %v2741_v61 = vpop.f32.mrf.mxu1  ;;  %v2634_v40 = vadd.f32 %v4436_v17, %v4425_v13 }
 0x11d   :  { %v2689_v38 = vpop.f32.mrf.mxu0  ;;  %3195 = vmatprep.subr.mxu0 %v5489_v47 }
 0x11e   :  { %3196 = vmatpush3.msra.mxu0 %v2453_v42  ;;  %v2742_v1 = vpop.f32.mrf.mxu1  ;;  %v2631_v42 = vadd.f32 %v4417_v10, %v4404_v4  ;;  %v495_v36 = vadd.f32 %v2634_v40, %v2581_v34  ;;  %v2690_v16 = vadd.f32 %v2689_v38, %v2688_v31  ;;  %v2587_v4 = vadd.f32 %v4496_v37, %v4483_v32 }
 0x11f   :  { %v2691_v41 = vpop.f32.mrf.mxu0  ;;  %3197 = vmatprep.subr.mxu0 %v5489_v47  ;;  %v2640_v10 = vadd.f32 %v4498_v27, %v4485_v33  ;;  %v2737_v32 = vadd.f32 %v4630_v44, %v4616_v18  ;;  %v2743_v31 = vadd.f32 %v2742_v1, %v2741_v61 }
 0x120   :  { %3198 = vmatpush3.msra.mxu0 %v2452_v49  ;;  %v2744_v7 = vpop.f32.mrf.mxu1  ;;  %v2584_v49 = vadd.f32 %v4461_v25, %v4448_v21  ;;  %v490_v13 = vadd.f32 %v2631_v42, %v4406_v6  ;;  %v2590_v25 = vadd.f32 %v4529_v51, %v4516_v43 }
 0x121   :  { %v2692_v48 = vpop.f32.mrf.mxu0  ;;  %3199 = vmatprep.subr.mxu0 %v5489_v47  ;;  %v505_v33 = vadd.f32 %v2640_v10, %v2587_v4 }
 0x122   :  { %3200 = vmatpush3.msra.mxu0 %v2451_v53  ;;  %v2745_v15 = vpop.f32.mrf.mxu1  ;;  %v2637_v53 = vadd.f32 %v4463_v26, %v4450_v22  ;;  %v2643_v26 = vadd.f32 %v4533_v52, %v4518_v45  ;;  %v2693_v8 = vadd.f32 %v2692_v48, %v2691_v41  ;;  %v2593_v45 = vadd.f32 %v4557_v58, %v4545_v54 }
 0x123   :  { %v2694_v50 = vpop.f32.mrf.mxu0  ;;  %3201 = vmatprep.subr.mxu0 %v5489_v47  ;;  %v2746_v35 = vadd.f32 %v2745_v15, %v2744_v7 }
 0x124   :  { %3202 = vmatpush3.msra.mxu0 %v2450_v57  ;;  %v2747_v62 = vpop.f32.mrf.mxu1  ;;  %v500_v17 = vadd.f32 %v2637_v53, %v2584_v49  ;;  %v510_v43 = vadd.f32 %v2643_v26, %v2590_v25  ;;  %v605_v52 = vadd.f32 %v2693_v8, %v505_v33 }
 0x125   :  { %v2695_v55 = vpop.f32.mrf.mxu0  ;;  %3203 = vmatprep.subr.mxu0 %v5489_v47 }
 0x126   :  { %3204 = vmatpush3.msra.mxu0 %v2449_v63  ;;  %v2748_v57 = vpop.f32.mrf.mxu1  ;;  %v600_v37 = vadd.f32 %v2690_v16, %v500_v17  ;;  %v2696_v27 = vadd.f32 %v2695_v55, %v2694_v50  ;;  %v705_v7 = vadd.f32 %v2746_v35, %v605_v52 }
 0x127   :  { %v4662_v59 = vpop.f32.mrf.mxu0  ;;  %3205 = vmatprep.subr.mxu0 %v5489_v47 }
 0x128   :  { %3206 = vmatpush3.msra.mxu0 %v2448_v3  ;;  %v2687_v3 = vadd.f32 %v2686_v29, %v2685_v23  ;;  %v590_v29 = vadd.f32 %v2684_v12, %v490_v13  ;;  %v700_v48 = vadd.f32 %v2743_v31, %v600_v37  ;;  %v610_v61 = vadd.f32 %v2696_v27, %v510_v43 }
 0x129   :  { %v2698_v60 = vpop.f32.mrf.mxu0  ;;  %3281 = vmatprep.subr.mxu0 %v5489_v47  ;;  %v2750_v21 = vpop.f32.mrf.mxu1 }
 0x12a   :  { %v595_v23 = vadd.f32 %v2687_v3, %v495_v36  ;;  %v2646_v36 = vadd.f32 %v4569_v0, %v4551_v56  ;;  %v690_v44 = vadd.f32 %v2737_v32, %v590_v29  ;;  %v2699_v50 = vadd.f32 %v2698_v60, %v4662_v59 }
 0x12b   :  { %v4674_v9 = vpop.f32.mrf.mxu0  ;;  %v2751_v38 = vpop.f32.mrf.mxu1  ;;  %v2596_v56 = vadd.f32 %v4585_v5, %v4576_v2  ;;  %v2649_v0 = vadd.f32 %v4605_v19, %v4588_v39 }
 0x12c   :  { %v695_v51 = vadd.f32 %v2740_v11, %v595_v23  ;;  %v515_v58 = vadd.f32 %v2646_v36, %v2593_v45  ;;  %v4723_v19 = vpop.permute.xlu1 %931 }
 0x12d   :  { %v4676_v20 = vpop.f32.mrf.mxu0  ;;  %v2753_v55 = vpop.f32.mrf.mxu1 }
 0x12e   :  { %v615_v60 = vadd.f32 %v2699_v50, %v515_v58 }
 0x130   :  { %v4741_v32 = vpop.permute.xlu1 %1253 }
 0x134   :  { %v2788_v28 = vpop.f32.mrf.mxu0  ;;  %v4747_v35 = vpop.permute.xlu1 %1257 }
 0x136   :  { %v2789_v30 = vpop.f32.mrf.mxu0 }
 0x137   :  { %v2790_v41 = vadd.f32 %v2789_v30, %v2788_v28  ;;  %v2702_v30 = vadd.f32 %v4676_v20, %v4674_v9 }
 0x138   :  { %v2791_v63 = vpop.f32.mrf.mxu0 }
 0x139   :  { %v4713_v15 = vadd.f32 %v2790_v41, %v690_v44 }
 0x13a   :  { %v2792_v47 = vpop.f32.mrf.mxu0 }
 0x13b   :  { %v2793_v34 = vadd.f32 %v2792_v47, %v2791_v63  ;;  %v2749_v47 = vadd.f32 %v2748_v57, %v2747_v62  ;;  %v2752_v62 = vadd.f32 %v2751_v38, %v2750_v21  ;;  %v2754_v57 = vpop.f32.mrf.mxu1  ;;  %v520_v63 = vadd.f32 %v2649_v0, %v2596_v56 }
 0x13c   :  { %v2794_v22 = vpop.f32.mrf.mxu0  ;;  %v837_v3 = vmul.f32 %v4713_v15, %v4713_v15  ;;  %v2755_v4 = vadd.f32 %v2754_v57, %v2753_v55 }
 0x13d   :  { %v4707_v1 = vadd.f32 %v2793_v34, %v695_v51  ;;  %v710_v53 = vadd.f32 %v2749_v47, %v610_v61  ;;  %v715_v13 = vadd.f32 %v2752_v62, %v615_v60  ;;  %v620_v17 = vadd.f32 %v2702_v30, %v520_v63  ;;  %v4749_v47 = vpop.permute.xlu1 %941 }
 0x13e   :  { %v2795_v6 = vpop.f32.mrf.mxu0  ;;  %v869_v63 = vlaneseq }
 0x13f   :  { %v2796_v46 = vadd.f32 %v2795_v6, %v2794_v22  ;;  %v838_v2 = vmul.f32 %v4707_v1, %v4707_v1  ;;  %v823_v12 = vadd.f32 %v4707_v1, %v4713_v15  ;;  %v720_v37 = vadd.f32 %v2755_v4, %v620_v17 }
 0x140   :  { %v2797_v40 = vpop.f32.mrf.mxu0 }
 0x141   :  { %v4715_v28 = vadd.f32 %v2796_v46, %v700_v48  ;;  %v844_v21 = vadd.f32 %v838_v2, %v837_v3  ;;  %v4755_v2 = vpop.permute.xlu0 %990 }
 0x142   :  { %v2798_v18 = vpop.f32.mrf.mxu0 }
 0x143   :  { %v2799_v42 = vadd.f32 %v2798_v18, %v2797_v40  ;;  %v839_v9 = vmul.f32 %v4715_v28, %v4715_v28  ;;  %v824_v22 = vadd.f32 %v823_v12, %v4715_v28  ;;  %v870_v12 = vshrl.u32 %v869_v63, 7  ;;  %v2445_v63 = vld [vmem:[%s5485_s4 + $0x168] sm:$0xff] }
 0x144   :  { %v2800_v54 = vpop.f32.mrf.mxu0 }
 0x145   :  { %v4721_v5 = vadd.f32 %v2799_v42, %v705_v7  ;;  %v845_v11 = vadd.f32 %v844_v21, %v839_v9  ;;  %v4751_v7 = vpop.permute.xlu1 %946  ;;  %v4759_v3 = vpop.permute.xlu0 %994  ;;  %v871_v17 = vsub.s32 0, %v870_v12 }
 0x146   :  { %v2801_v59 = vpop.f32.mrf.mxu0 }
 0x147   :  { %v2802_v49 = vadd.f32 %v2801_v59, %v2800_v54  ;;  %v840_v25 = vmul.f32 %v4721_v5, %v4721_v5  ;;  %v825_v8 = vadd.f32 %v824_v22, %v4721_v5  ;;  %v865_v22 = vld [vmem:[%s5487_s3] sm:$0x1] }
 0x148   :  { %v2803_v39 = vpop.f32.mrf.mxu0 }
 0x149   :  { %v4731_v20 = vadd.f32 %v2802_v49, %v710_v53  ;;  %v846_v33 = vadd.f32 %v845_v11, %v840_v25  ;;  %v4753_v53 = vpop.permute.xlu1 %1265 }
 0x14a   :  { %v2804_v16 = vpop.f32.mrf.mxu0 }
 0x14b   :  { %v2805_v10 = vadd.f32 %v2804_v16, %v2803_v39  ;;  %v841_v6 = vmul.f32 %v4731_v20, %v4731_v20  ;;  %v826_v27 = vadd.f32 %v825_v8, %v4731_v20  ;;  %v861_v16 = vld [vmem:[%s5486_s2] sm:$0x1] }
 0x14c   :  { %v2806_v26 = vpop.f32.mrf.mxu0 }
 0x14d   :  { %v4736_v23 = vadd.f32 %v2805_v10, %v715_v13  ;;  %v847_v40 = vadd.f32 %v846_v33, %v841_v6  ;;  %v4757_v39 = vpop.permute.xlu1 %1269  ;;  %v4766_v13 = vpop.permute.xlu0 %1006 }
 0x14e   :  { %v2807_v29 = vpop.f32.mrf.mxu0 }
 0x14f   :  { %v2808_v31 = vadd.f32 %v2807_v29, %v2806_v26  ;;  %v842_v38 = vmul.f32 %v4736_v23, %v4736_v23  ;;  %v827_v43 = vadd.f32 %v826_v27, %v4736_v23 }
 0x151   :  { %v820_v34 = vadd.f32 %v2808_v31, %v720_v37  ;;  %v848_v51 = vadd.f32 %v847_v40, %v842_v38  ;;  %v4761_v9 = vpop.permute.xlu1 %956  ;;  %v4773_v11 = vpop.permute.xlu0 %1014 }
 0x153   :  { %v829_v45 = vsel %vm828_vm1, %v820_v34, 0.0  ;;  %v843_v36 = vmul.f32 %v820_v34, %v820_v34 }
 0x154   :  { %v830_v52 = vadd.f32 %v829_v45, %v827_v43 }
 0x155   :  { %v849_v41 = vsel %vm828_vm1, %v843_v36, 0.0  ;;  %v4768_v21 = vpop.permute.xlu1 %1415 }
 0x156   :  { %v831_v46 = vrot.slane %v830_v52, 4  ;;  %v850_v18 = vadd.f32 %v849_v41, %v848_v51 }
 0x158   :  { %v832_v44 = vadd.f32 %v831_v46, %v830_v52  ;;  %v851_v48 = vrot.slane %v850_v18, 4  ;;  %v4785_v46 = vpop.permute.xlu0 %1249 }
 0x159   :  { %v4778_v27 = vpop.permute.xlu1 %1581 }
 0x15a   :  { %v833_v50 = vrot.slane %v832_v44, 2  ;;  %v852_v61 = vadd.f32 %v851_v48, %v850_v18 }
 0x15c   :  { %v834_v55 = vadd.f32 %v833_v50, %v832_v44  ;;  %v853_v42 = vrot.slane %v852_v61, 2 }
 0x15e   :  { %v835_v54 = vrot.slane %v834_v55, 1  ;;  %v854_v58 = vadd.f32 %v853_v42, %v852_v61  ;;  %v937_v61 = vpop.permute.xlu0 %936 }
 0x160   :  { %v836_v56 = vadd.f32 %v835_v54, %v834_v55  ;;  %v855_v0 = vrot.slane %v854_v58, 1  ;;  %v5492_v55 = vmov 0.0  }
 0x162   :  { %v856_v59 = vadd.f32 %v855_v0, %v854_v58  ;;  %v857_v60 = vmul.f32 0.020408163, %v836_v56  ;;  %v4808_v56 = vpop.permute.xlu0 %1261 }
 0x164   :  { %v858_v62 = vmul.f32 0.020408163, %v856_v59  ;;  %v859_v30 = vmul.f32 %v857_v60, %v857_v60 }
 0x166   :  { %v860_v49 = vsub.f32 %v858_v62, %v859_v30  ;;  %v2447_v62 = vld [vmem:[%s5485_s4 + $0x178] sm:$0xff] }
 0x168   :  { %v862_v57 = vadd.f32 1e-05, %v860_v49  ;;  %v2446_v49 = vld [vmem:[%s5485_s4 + $0x170] sm:$0xff] }
 0x16a   :  { %3542 = vrsqrt.f32 %v862_v57  ;;  %v4824_v57 = vld [vmem:[#allocation2] sm:$0xff] }
 0x177   :  { %v3543_v4 = vpop.eup %3542 }
 0x178   :  { %v864_v10 = vmul.f32 %v3543_v4, %v861_v16  ;;  %v2444_v4 = vld [vmem:[%s5485_s4 + $0x160] sm:$0xff] }
 0x17a   :  { %v866_v25 = vmul.f32 %v864_v10, %v857_v60  ;;  %v872_v26 = vrot.slane %v864_v10, %v871_v17 }
 0x17c   :  { %v867_v8 = vsub.f32 %v865_v22, %v866_v25  ;;  %v880_v6 = vmul.f32 %v872_v26, %v820_v34  ;;  %v875_v37 = vmul.f32 %v872_v26, %v4707_v1  ;;  %v876_v31 = vmul.f32 %v872_v26, %v4715_v28  ;;  %v2443_v22 = vld [vmem:[%s5485_s4 + $0x158] sm:$0xff] }
 0x17d   :  { %v877_v33 = vmul.f32 %v872_v26, %v4721_v5  ;;  %v878_v38 = vmul.f32 %v872_v26, %v4731_v20  ;;  %v879_v40 = vmul.f32 %v872_v26, %v4736_v23  ;;  %v874_v43 = vmul.f32 %v872_v26, %v4713_v15  ;;  %v4793_v15 = vpop.permute.xlu1 %1585 }
 0x17e   :  { %v885_v29 = vrot.slane %v867_v8, %v871_v17 }
 0x180   :  { %v893_v45 = vadd.f32 %v885_v29, %v880_v6  ;;  %v888_v36 = vadd.f32 %v885_v29, %v875_v37  ;;  %v889_v51 = vadd.f32 %v885_v29, %v876_v31  ;;  %v890_v52 = vadd.f32 %v885_v29, %v877_v33 }
 0x181   :  { %v891_v34 = vadd.f32 %v885_v29, %v878_v38  ;;  %v4783_v41 = vadd.f32 %v885_v29, %v879_v40  ;;  %v887_v1 = vadd.f32 %v885_v29, %v874_v43  ;;  %v4802_v54 = vpop.permute.xlu1 %1423  ;;  %v2441_v29 = vld [vmem:[%s5485_s4 + $0x148] sm:$0xff]  ;;  %v2439_v38 = vld [vmem:[%s5485_s4 + $0x138] sm:$0xff] }
 0x182   :  { %v900_v28 = vmax.f32 %v893_v45, 0.0  ;;  %v895_v5 = vmax.f32 %v888_v36, 0.0  ;;  %v4787_v18 = vmax.f32 %v889_v51, 0.0  ;;  %v897_v44 = vmax.f32 %v890_v52, 0.0  ;;  %v2494_v45 = vld [vmem:[%s5485_s4 + $0x2f0] sm:$0xff]  ;;  %v5493_v51 = vld [vmem:[#allocation3_spill] sm:$0xff] }
 0x183   :  { %v898_v20 = vmax.f32 %v891_v34, 0.0  ;;  %v899_v23 = vmax.f32 %v4783_v41, 0.0  ;;  %v4790_v48 = vmax.f32 %v887_v1, 0.0  ;;  %v2437_v34 = vld [vmem:[%s5485_s4 + $0x128] sm:$0xff] }
 0x184   :  { %909 = vst [vmem:[#allocation2 + $0x38] sm:$0x1] %v900_v28  ;;  %904 = vst [vmem:[#allocation2 + $0x10] sm:$0xff] %v895_v5  ;;  %v961_v42 = vmul.f32 %v937_v61, %v895_v5  ;;  %v962_v58 = vmul.f32 %v4749_v47, %v4787_v18  ;;  %v963_v59 = vmul.f32 %v4751_v7, %v897_v44  ;;  %v952_v47 = vpop.permute.xlu0 %951  ;;  %v2436_v5 = vld [vmem:[%s5485_s4 + $0x120] sm:$0xff]  ;;  %v2435_v61 = vld [vmem:[%s5485_s4 + $0x118] sm:$0xff] }
 0x185   :  { %905 = vst [vmem:[#allocation2 + $0x18] sm:$0xff] %v4787_v18  ;;  %906 = vst [vmem:[#allocation2 + $0x20] sm:$0xff] %v897_v44  ;;  %v960_v50 = vmul.f32 %v4723_v19, %v4790_v48  ;;  %v4812_v19 = vpop.permute.xlu1 %1427  ;;  %v964_v7 = vmul.f32 %v952_v47, %v898_v20  ;;  %v2513_v41 = vld [vmem:[%s5485_s4 + $0x388] sm:$0xff] }
 0x186   :  { %907 = vst [vmem:[#allocation2 + $0x28] sm:$0xff] %v898_v20  ;;  %908 = vst [vmem:[#allocation2 + $0x30] sm:$0xff] %v899_v23 }
 0x187   :  { %903 = vst [vmem:[#allocation2 + $0x8] sm:$0xff] %v4790_v48  ;;  %3105 = vmatmul.mubr.f32.gmra.mxu0 %v960_v50 }
 0x188   :  { %3107 = vmatprep.mubr.msk.f32.mxu0 %vm3561_vm0, %v5492_v55  ;;  %v4885_v31 = vpop.permute.xlu0 %1273 }
 0x189   :  { %v4836_v16 = vpop.permute.xlu1 %1593 }
 0x18b   :  { %3108 = vmatmul.mubr.f32.gmra.mxu0 %v961_v42  ;;  %v2434_v42 = vld [vmem:[%s5485_s4 + $0x110] sm:$0xff] }
 0x18c   :  { %3110 = vmatprep.mubr.msk.f32.mxu0 %vm3561_vm0, %v5492_v55  ;;  %v4838_v17 = vld [vmem:[#allocation2 + $0x11] sm:$0xff]  ;;  %v4855_v26 = vld [vmem:[#allocation2 + $0x19] sm:$0xff]  ;;  %v1420_v28 = vpop.permute.xlu0 %1419 }
 0x18d   :  { %v916_v12 = vld [vmem:[#allocation2 + $0x30] sm:$0x1]  ;;  %v1019_v10 = vmul.f32 %v4838_v17, %v4427_v14  ;;  %v4861_v14 = vpop.permute.xlu1 %1597  ;;  %v1020_v6 = vmul.f32 %v4855_v26, %v4459_v24  ;;  %v4874_v37 = vld [vmem:[#allocation2 + $0x21] sm:$0xff]  ;;  %v988_v1 = vld [vmem:[#allocation2 + $0x31] sm:$0x1] }
 0x18e   :  { %v982_v0 = vld [vmem:[#allocation2 + $0x1] sm:$0xff]  ;;  %v4819_v30 = vld [vmem:[#allocation2 + $0x9] sm:$0xff]  ;;  %v1021_v33 = vmul.f32 %v4874_v37, %v4766_v13  ;;  %v1023_v50 = vmul.f32 %v4773_v11, %v988_v1 }
 0x18f   :  { %3111 = vmatmul.mubr.f32.gmra.mxu0 %v962_v58  ;;  %v1017_v60 = vmul.f32 %v4755_v2, %v982_v0  ;;  %v1018_v2 = vmul.f32 %v4819_v30, %v4759_v3  ;;  %v965_v3 = vmul.f32 %v4761_v9, %v916_v12  ;;  %v1407_v25 = vld [vmem:[#allocation2 + $0x7] sm:$0xff]  ;;  %v2442_v9 = vld [vmem:[%s5485_s4 + $0x150] sm:$0xff]  ;;  %v4976_v12 = vld [vmem:[#allocation2 + $0x1f] sm:$0xff] }
 0x190   :  { %3113 = vmatprep.mubr.msk.f32.mxu0 %vm3561_vm0, %v5492_v55  ;;  %v1442_v8 = vmul.f32 %v4768_v21, %v1407_v25  ;;  %v2495_v21 = vld [vmem:[%s5485_s4 + $0x2f8] sm:$0xff]  ;;  %v2440_v24 = vld [vmem:[%s5485_s4 + $0x140] sm:$0xff]  ;;  %v4895_v43 = vld [vmem:[#allocation2 + $0x29] sm:$0xff] }
 0x191   :  { %3049 = vmatmul.mubr.f32.vlgmr.msra.gmra.mxu1 %v1017_v60  ;;  %v4893_v40 = vpop.permute.xlu1 %1435  ;;  %v2438_v13 = vld [vmem:[%s5485_s4 + $0x130] sm:$0xff]  ;;  %v1022_v52 = vmul.f32 %v4895_v43, %v5493_v51  ;;  %v2493_v55 = vld [vmem:[%s5485_s4 + $0x2e8] sm:$0xff]  ;;  %v2492_v11 = vld [vmem:[%s5485_s4 + $0x2e0] sm:$0xff] }
 0x192   :  { %3123 = vmatpush3.msra.mxu1 %v2447_v62  ;;  %3051 = vmatprep.mubr.msk.f32.mxu1 %vm3561_vm0, %v4824_v57  ;;  %v4907_v36 = vld [vmem:[#allocation2 + $0xf] sm:$0xff]  ;;  %v4942_v58 = vld [vmem:[#allocation2 + $0x17] sm:$0xff]  ;;  %v1241_v60 = vld [vmem:[#allocation2 + $0x2] sm:$0xff] }
 0x193   :  { %3114 = vmatmul.mubr.f32.gmra.mxu0 %v963_v59  ;;  %3124 = vmatprep.subr.mxu1 %v4824_v57  ;;  %v1443_v20 = vmul.f32 %v1420_v28, %v4907_v36  ;;  %v2433_v0 = vld [vmem:[%s5485_s4 + $0x108] sm:$0xff]  ;;  %v2432_v62 = vld [vmem:[%s5485_s4 + $0x100] sm:$0xff]  ;;  %v1444_v47 = vmul.f32 %v4942_v58, %v4802_v54 }
 0x194   :  { %3116 = vmatprep.mubr.msk.f32.mxu0 %vm3561_vm0, %v4824_v57  ;;  %3125 = vmatpush3.msra.mxu1 %v2446_v49  ;;  %v1276_v49 = vmul.f32 %v4785_v46, %v1241_v60  ;;  %v2478_v46 = vld [vmem:[%s5485_s4 + $0x270] sm:$0xff]  ;;  %v2489_v25 = vld [vmem:[%s5485_s4 + $0x2c8] sm:$0xff] }
 0x195   :  { %3126 = vmatprep.subr.mxu1 %v4824_v57  ;;  %3052 = vmatmul.mubr.f32.gmra.mxu1 %v1018_v2  ;;  %v4921_v44 = vpop.permute.xlu1 %1439  ;;  %v2491_v2 = vld [vmem:[%s5485_s4 + $0x2d8] sm:$0xff]  ;;  %v5029_v51 = vld [vmem:[#allocation2 + $0x2f] sm:$0xff] }
 0x196   :  { %3127 = vmatpush3.msra.mxu1 %v2445_v63  ;;  %3054 = vmatprep.mubr.msk.f32.mxu1 %vm3561_vm0, %v4824_v57  ;;  %v1242_v63 = vld [vmem:[#allocation2 + $0xa] sm:$0xff]  ;;  %v1447_v1 = vmul.f32 %v5029_v51, %v4893_v40  ;;  %v2472_v40 = vld [vmem:[%s5485_s4 + $0x240] sm:$0xff] }
 0x197   :  { %3117 = vmatmul.mubr.f32.gmra.mxu0 %v964_v7  ;;  %3128 = vmatprep.subr.mxu1 %v4824_v57  ;;  %v2479_v7 = vld [vmem:[%s5485_s4 + $0x278] sm:$0xff]  ;;  %v2473_v28 = vld [vmem:[%s5485_s4 + $0x248] sm:$0xff] }
 0x198   :  { %3119 = vmatprep.mubr.msk.f32.mxu0 %vm3561_vm0, %v4824_v57  ;;  %3129 = vmatpush3.msra.mxu1 %v2444_v4  ;;  %v2490_v4 = vld [vmem:[%s5485_s4 + $0x2d0] sm:$0xff] }
 0x199   :  { %3130 = vmatprep.subr.mxu1 %v4824_v57  ;;  %3055 = vmatmul.mubr.f32.gmra.mxu1 %v1019_v10  ;;  %v4949_v59 = vpop.permute.xlu1 %1605  ;;  %v1445_v10 = vmul.f32 %v4976_v12, %v4812_v19  ;;  %v2476_v19 = vld [vmem:[%s5485_s4 + $0x260] sm:$0xff] }
 0x19a   :  { %3131 = vmatpush3.msra.mxu1 %v2443_v22  ;;  %3057 = vmatprep.mubr.msk.f32.mxu1 %vm3561_vm0, %v4824_v57  ;;  %v2477_v22 = vld [vmem:[%s5485_s4 + $0x268] sm:$0xff] }
 0x19b   :  { %3120 = vmatmul.mubr.f32.gmra.mxu0 %v965_v3  ;;  %3132 = vmatprep.subr.mxu1 %v4824_v57  ;;  %v1277_v3 = vmul.f32 %v4741_v32, %v1242_v63  ;;  %v1243_v32 = vld [vmem:[#allocation2 + $0x12] sm:$0xff] }
 0x19c   :  { %3207 = vmatprep.mubr.msk.f32.mxu0 %vm3561_vm0, %v4824_v57  ;;  %3133 = vmatpush3.msra.mxu1 %v2442_v9 }
 0x19d   :  { %3134 = vmatprep.subr.mxu1 %v4824_v57  ;;  %3058 = vmatmul.mubr.f32.gmra.mxu1 %v1020_v6  ;;  %v4974_v54 = vpop.permute.xlu1 %1913  ;;  %v2488_v6 = vld [vmem:[%s5485_s4 + $0x2c0] sm:$0xff] }
 0x19e   :  { %3135 = vmatpush3.msra.mxu1 %v2441_v29  ;;  %3060 = vmatprep.mubr.msk.f32.mxu1 %vm3561_vm0, %v4824_v57  ;;  %v1278_v29 = vmul.f32 %v4747_v35, %v1243_v32  ;;  %v2474_v35 = vld [vmem:[%s5485_s4 + $0x250] sm:$0xff] }
 0x19f   :  { %3208 = vmatmul.mubr.f32.vlgmr.msra.gmra.mxu0 %v1442_v8  ;;  %3136 = vmatprep.subr.mxu1 %v4824_v57  ;;  %v5003_v8 = vld [vmem:[#allocation2 + $0x27] sm:$0xff] }
 0x1a0   :  { %3282 = vmatpush3.msra.mxu0 %v2495_v21  ;;  %3137 = vmatpush3.msra.mxu1 %v2440_v24  ;;  %v1432_v21 = vpop.permute.xlu0 %1431 }
 0x1a1   :  { %3283 = vmatprep.subr.mxu0 %v4824_v57  ;;  %3138 = vmatprep.subr.mxu1 %v4824_v57  ;;  %v5001_v9 = vpop.permute.xlu1 %1751  ;;  %v1446_v24 = vmul.f32 %v1432_v21, %v5003_v8  ;;  %v2526_v21 = vld [vmem:[%s5485_s4 + $0x3f0] sm:$0xff] }
 0x1a2   :  { %3061 = vmatmul.mubr.f32.gmra.mxu1 %v1021_v33  ;;  %3284 = vmatpush3.msra.mxu0 %v2494_v45  ;;  %v2475_v33 = vld [vmem:[%s5485_s4 + $0x258] sm:$0xff] }
 0x1a3   :  { %3139 = vmatpush3.msra.mxu1 %v2439_v38  ;;  %3063 = vmatprep.mubr.msk.f32.mxu1 %vm3561_vm0, %v4824_v57  ;;  %v2487_v38 = vld [vmem:[%s5485_s4 + $0x2b8] sm:$0xff] }
 0x1a4   :  { %3140 = vmatprep.subr.mxu1 %v4824_v57  ;;  %3210 = vmatprep.mubr.msk.f32.mxu0 %vm3561_vm0, %v4824_v57  ;;  %v1244_v45 = vld [vmem:[#allocation2 + $0x1a] sm:$0xff] }
 0x1a5   :  { %3141 = vmatpush3.msra.mxu1 %v2438_v13  ;;  %3285 = vmatprep.subr.mxu0 %v4824_v57  ;;  %v5027_v13 = vpop.permute.xlu1 %1755 }
 0x1a6   :  { %3142 = vmatprep.subr.mxu1 %v4824_v57  ;;  %3064 = vmatmul.mubr.f32.gmra.mxu1 %v1022_v52  ;;  %v2486_v52 = vld [vmem:[%s5485_s4 + $0x2b0] sm:$0xff] }
 0x1a7   :  { %3143 = vmatpush3.msra.mxu1 %v2437_v34  ;;  %3066 = vmatprep.mubr.msk.f32.mxu1 %vm3561_vm0, %v4824_v57  ;;  %v1279_v34 = vmul.f32 %v4808_v56, %v1244_v45  ;;  %v2485_v56 = vld [vmem:[%s5485_s4 + $0x2a8] sm:$0xff] }
 0x1a8   :  { %3144 = vmatprep.subr.mxu1 %v4824_v57  ;;  %3211 = vmatmul.mubr.f32.gmra.mxu0 %v1443_v20  ;;  %v2525_v45 = vld [vmem:[%s5485_s4 + $0x3e8] sm:$0xff] }
 0x1a9   :  { %3145 = vmatpush3.msra.mxu1 %v2436_v5  ;;  %3286 = vmatpush3.msra.mxu0 %v2493_v55  ;;  %v1245_v5 = vld [vmem:[#allocation2 + $0x22] sm:$0xff] }
 0x1aa   :  { %3146 = vmatprep.subr.mxu1 %v4824_v57  ;;  %3067 = vmatmul.mubr.f32.gmra.mxu1 %v1023_v50  ;;  %v5052_v50 = vpop.permute.xlu0 %1589  ;;  %v2484_v55 = vld [vmem:[%s5485_s4 + $0x2a0] sm:$0xff] }
 0x1ab   :  { %3147 = vmatpush3.msra.mxu1 %v2435_v61  ;;  %3287 = vmatprep.subr.mxu0 %v4824_v57  ;;  %v5058_v61 = vpop.permute.xlu1 %1921 }
 0x1ac   :  { %3148 = vmatprep.subr.mxu1 %v4824_v57  ;;  %3154 = vmatprep.mubr.msk.f32.mxu1 %vm3561_vm0, %v4824_v57 }
 0x1ad   :  { %3149 = vmatpush3.msra.mxu1 %v2434_v42  ;;  %3288 = vmatpush3.msra.mxu0 %v2492_v11  ;;  %v1413_v42 = vld [vmem:[#allocation2 + $0x37] sm:$0x1] }
 0x1ae   :  { %3150 = vmatprep.subr.mxu1 %v4824_v57  ;;  %3213 = vmatprep.mubr.msk.f32.mxu0 %vm3561_vm0, %v4824_v57  ;;  %v1448_v60 = vmul.f32 %v4921_v44, %v1413_v42  ;;  %v2470_v44 = vld [vmem:[%s5485_s4 + $0x230] sm:$0xff]  ;;  %v2509_v42 = vld [vmem:[%s5485_s4 + $0x368] sm:$0xff] }
 0x1af   :  { %3151 = vmatpush3.msra.mxu1 %v2433_v0  ;;  %3289 = vmatprep.subr.mxu0 %v4824_v57  ;;  %v1280_v0 = vmul.f32 %v4753_v53, %v1245_v5  ;;  %v1246_v53 = vld [vmem:[#allocation2 + $0x2a] sm:$0xff] }
 0x1b0   :  { %3152 = vmatprep.subr.mxu1 %v4824_v57  ;;  %3214 = vmatmul.mubr.f32.gmra.mxu0 %v1444_v47  ;;  %v2483_v47 = vld [vmem:[%s5485_s4 + $0x298] sm:$0xff]  ;;  %v1281_v63 = vmul.f32 %v4757_v39, %v1246_v53  ;;  %v2468_v39 = vld [vmem:[%s5485_s4 + $0x220] sm:$0xff]  ;;  %v2506_v53 = vld [vmem:[%s5485_s4 + $0x350] sm:$0xff] }
 0x1b1   :  { %3153 = vmatpush3.msra.mxu1 %v2432_v62  ;;  %3290 = vmatpush3.msra.mxu0 %v2491_v2  ;;  %v2471_v62 = vld [vmem:[%s5485_s4 + $0x238] sm:$0xff]  ;;  %v2482_v2 = vld [vmem:[%s5485_s4 + $0x290] sm:$0xff] }
 0x1b2   :  { %3155 = vmatmul.mubr.f32.vlgmr.msra.gmra.mxu1 %v1276_v49  ;;  %3228 = vmatprep.subr.mxu1 %v4824_v57  ;;  %v5078_v49 = vpop.permute.xlu0 %1601 }
 0x1b3   :  { %3229 = vmatpush3.msra.mxu1 %v2479_v7  ;;  %3291 = vmatprep.subr.mxu0 %v4824_v57  ;;  %v5084_v7 = vpop.permute.xlu1 %1925 }
 0x1b4   :  { %3230 = vmatprep.subr.mxu1 %v4824_v57  ;;  %3157 = vmatprep.mubr.msk.f32.mxu1 %vm3561_vm0, %v4824_v57 }
 0x1b5   :  { %3231 = vmatpush3.msra.mxu1 %v2478_v46  ;;  %3292 = vmatpush3.msra.mxu0 %v2490_v4  ;;  %v2469_v46 = vld [vmem:[%s5485_s4 + $0x228] sm:$0xff] }
 0x1b6   :  { %3158 = vmatmul.mubr.f32.gmra.mxu1 %v1277_v3  ;;  %3216 = vmatprep.mubr.msk.f32.mxu0 %vm3561_vm0, %v4824_v57  ;;  %v2481_v4 = vld [vmem:[%s5485_s4 + $0x288] sm:$0xff]  ;;  %v1247_v3 = vld [vmem:[#allocation2 + $0x32] sm:$0x1] }
 0x1b7   :  { %3232 = vmatprep.subr.mxu1 %v4824_v57  ;;  %3293 = vmatprep.subr.mxu0 %v4824_v57  ;;  %v1282_v32 = vmul.f32 %v4885_v31, %v1247_v3  ;;  %v2517_v3 = vld [vmem:[%s5485_s4 + $0x3a8] sm:$0xff] }
 0x1b8   :  { %3217 = vmatmul.mubr.f32.gmra.mxu0 %v1445_v10  ;;  %3233 = vmatpush3.msra.mxu1 %v2477_v22  ;;  %v1748_v10 = vpop.permute.xlu0 %1747  ;;  %v2480_v22 = vld [vmem:[%s5485_s4 + $0x280] sm:$0xff] }
 0x1b9   :  { %3294 = vmatpush3.msra.mxu0 %v2489_v25  ;;  %3234 = vmatprep.subr.mxu1 %v4824_v57  ;;  %v5108_v25 = vpop.permute.xlu1 %1763 }
 0x1ba   :  { %3295 = vmatprep.subr.mxu0 %v4824_v57  ;;  %3160 = vmatprep.mubr.msk.f32.mxu1 %vm3561_vm0, %v4824_v57 }
 0x1bb   :  { %3235 = vmatpush3.msra.mxu1 %v2476_v19  ;;  %3296 = vmatpush3.msra.mxu0 %v2488_v6  ;;  %v1774_v19 = vmul.f32 %v1748_v10, %v4819_v30  ;;  %v2467_v6 = vld [vmem:[%s5485_s4 + $0x218] sm:$0xff]  ;;  %v2466_v30 = vld [vmem:[%s5485_s4 + $0x210] sm:$0xff]  ;;  %v2516_v10 = vld [vmem:[%s5485_s4 + $0x3a0] sm:$0xff] }
 0x1bc   :  { %3161 = vmatmul.mubr.f32.gmra.mxu1 %v1278_v29  ;;  %3219 = vmatprep.mubr.msk.f32.mxu0 %vm3561_vm0, %v4824_v57  ;;  %v2527_v29 = vld [vmem:[%s5485_s4 + $0x3f8] sm:$0xff]  ;;  %v5129_v31 = vpop.permute.xlu0 %1917 }
 0x1bd   :  { %3236 = vmatprep.subr.mxu1 %v4824_v57  ;;  %3297 = vmatprep.subr.mxu0 %v4824_v57 }
 0x1be   :  { %3220 = vmatmul.mubr.f32.gmra.mxu0 %v1446_v24  ;;  %3237 = vmatpush3.msra.mxu1 %v2475_v33  ;;  %v5134_v24 = vpop.permute.xlu1 %1767  ;;  %v1775_v33 = vmul.f32 %v5001_v9, %v4838_v17  ;;  %v2464_v17 = vld [vmem:[%s5485_s4 + $0x200] sm:$0xff] }
 0x1bf   :  { %3298 = vmatpush3.msra.mxu0 %v2487_v38  ;;  %3238 = vmatprep.subr.mxu1 %v4824_v57  ;;  %v2465_v38 = vld [vmem:[%s5485_s4 + $0x208] sm:$0xff]  ;;  %v2524_v9 = vld [vmem:[%s5485_s4 + $0x3e0] sm:$0xff] }
 0x1c0   :  { %3299 = vmatprep.subr.mxu0 %v4824_v57  ;;  %3163 = vmatprep.mubr.msk.f32.mxu1 %vm3561_vm0, %v4824_v57  ;;  %v5050_v20 = vpop.f32.mrf.mxu0 }
 0x1c1   :  { %3239 = vmatpush3.msra.mxu1 %v2474_v35  ;;  %3300 = vmatpush3.msra.mxu0 %v2486_v52  ;;  %v5156_v35 = vpop.permute.xlu0 %1929  ;;  %v1776_v52 = vmul.f32 %v5027_v13, %v4855_v26  ;;  %v2523_v26 = vld [vmem:[%s5485_s4 + $0x3d8] sm:$0xff]  ;;  %v1574_v13 = vld [vmem:[#allocation2 + $0x10] sm:$0xff] }
 0x1c2   :  { %3164 = vmatmul.mubr.f32.gmra.mxu1 %v1279_v34  ;;  %3222 = vmatprep.mubr.msk.f32.mxu0 %vm3561_vm0, %v4824_v57  ;;  %v3103_v11 = vpop.f32.mrf.mxu0  ;;  %v5162_v34 = vpop.permute.xlu1 %1933 }
 0x1c3   :  { %3240 = vmatprep.subr.mxu1 %v4824_v57  ;;  %3301 = vmatprep.subr.mxu0 %v4824_v57  ;;  %v2521_v11 = vld [vmem:[%s5485_s4 + $0x3c8] sm:$0xff] }
 0x1c4   :  { %3223 = vmatmul.mubr.f32.gmra.mxu0 %v1447_v1  ;;  %3241 = vmatpush3.msra.mxu1 %v2473_v28  ;;  %v1608_v1 = vmul.f32 %v4778_v27, %v4790_v48  ;;  %v2511_v28 = vld [vmem:[%s5485_s4 + $0x378] sm:$0xff]  ;;  %v2510_v27 = vld [vmem:[%s5485_s4 + $0x370] sm:$0xff] }
 0x1c5   :  { %3302 = vmatpush3.msra.mxu0 %v2485_v56  ;;  %3242 = vmatprep.subr.mxu1 %v4824_v57  ;;  %v2522_v48 = vld [vmem:[%s5485_s4 + $0x3d0] sm:$0xff]  ;;  %v1760_v56 = vpop.permute.xlu0 %1759 }
 0x1c6   :  { %3303 = vmatprep.subr.mxu0 %v4824_v57  ;;  %3166 = vmatprep.mubr.msk.f32.mxu1 %vm3561_vm0, %v4824_v57  ;;  %v5186_v5 = vpop.permute.xlu1 %1937 }
 0x1c7   :  { %3243 = vmatpush3.msra.mxu1 %v2472_v40  ;;  %3304 = vmatpush3.msra.mxu0 %v2484_v55  ;;  %v1777_v40 = vmul.f32 %v1760_v56, %v4874_v37  ;;  %v1609_v55 = vmul.f32 %v4793_v15, %v1574_v13  ;;  %v2508_v15 = vld [vmem:[%s5485_s4 + $0x360] sm:$0xff]  ;;  %v1905_v13 = vld [vmem:[#allocation2 + $0xe] sm:$0xff] }
 0x1c8   :  { %3167 = vmatmul.mubr.f32.gmra.mxu1 %v1280_v0  ;;  %3225 = vmatprep.mubr.msk.f32.mxu0 %vm3561_vm0, %v4824_v57  ;;  %v2520_v37 = vld [vmem:[%s5485_s4 + $0x3c0] sm:$0xff]  ;;  %v1778_v0 = vmul.f32 %v5108_v25, %v4895_v43  ;;  %v2519_v43 = vld [vmem:[%s5485_s4 + $0x3b8] sm:$0xff] }
 0x1c9   :  { %3244 = vmatprep.subr.mxu1 %v4824_v57  ;;  %3305 = vmatprep.subr.mxu0 %v4824_v57 }
 0x1ca   :  { %3226 = vmatmul.mubr.f32.gmra.mxu0 %v1448_v60  ;;  %3245 = vmatpush3.msra.mxu1 %v2471_v62  ;;  %v1610_v60 = vmul.f32 %v5052_v50, %v4787_v18  ;;  %v5214_v62 = vpop.permute.xlu1 %2079  ;;  %v1744_v18 = vld [vmem:[#allocation2 + $0x31] sm:$0xff]  ;;  %v1576_v50 = vld [vmem:[#allocation2 + $0x20] sm:$0xff] }
 0x1cb   :  { %3306 = vmatpush3.msra.mxu0 %v2483_v47  ;;  %3246 = vmatprep.subr.mxu1 %v4824_v57  ;;  %v2507_v47 = vld [vmem:[%s5485_s4 + $0x358] sm:$0xff] }
 0x1cc   :  { %3307 = vmatprep.subr.mxu0 %v4824_v57  ;;  %3169 = vmatprep.mubr.msk.f32.mxu1 %vm3561_vm0, %v4824_v57 }
 0x1cd   :  { %3247 = vmatpush3.msra.mxu1 %v2470_v44  ;;  %3308 = vmatpush3.msra.mxu0 %v2482_v2  ;;  %v2518_v44 = vld [vmem:[%s5485_s4 + $0x3b0] sm:$0xff]  ;;  %v1779_v2 = vmul.f32 %v5134_v24, %v1744_v18  ;;  %v1613_v24 = vmul.f32 %v5078_v49, %v899_v23  ;;  %v2500_v23 = vld [vmem:[%s5485_s4 + $0x320] sm:$0xff]  ;;  %v1579_v49 = vld [vmem:[#allocation2 + $0x38] sm:$0x1] }
 0x1ce   :  { %3170 = vmatmul.mubr.f32.gmra.mxu1 %v1281_v63  ;;  %3248 = vmatprep.subr.mxu1 %v4824_v57  ;;  %v5237_v63 = vpop.permute.xlu1 %2083 }
 0x1cf   :  { %3309 = vmatprep.subr.mxu0 %v4824_v57  ;;  %3249 = vmatpush3.msra.mxu1 %v2469_v46  ;;  %v1611_v46 = vmul.f32 %v4836_v16, %v1576_v50  ;;  %v2504_v16 = vld [vmem:[%s5485_s4 + $0x340] sm:$0xff] }
 0x1d0   :  { %3310 = vmatpush3.msra.mxu0 %v2481_v4  ;;  %3250 = vmatprep.subr.mxu1 %v4824_v57  ;;  %v2505_v4 = vld [vmem:[%s5485_s4 + $0x348] sm:$0xff] }
 0x1d1   :  { %3311 = vmatprep.subr.mxu0 %v4824_v57  ;;  %3172 = vmatprep.mubr.msk.f32.mxu1 %vm3561_vm0, %v4824_v57 }
 0x1d2   :  { %3251 = vmatpush3.msra.mxu1 %v2468_v39  ;;  %3312 = vmatpush3.msra.mxu0 %v2480_v22  ;;  %v1577_v39 = vld [vmem:[#allocation2 + $0x28] sm:$0xff]  ;;  %v5261_v25 = vpop.permute.xlu1 %2249 }
 0x1d3   :  { %3313 = vmatprep.mubr.msk.f32.mxu0 %vm3561_vm0, %v4824_v57  ;;  %3173 = vmatmul.mubr.f32.gmra.mxu1 %v1282_v32  ;;  %v1612_v22 = vmul.f32 %v4861_v14, %v1577_v39  ;;  %v1745_v32 = vld [vmem:[#allocation2 + $0x39] sm:$0x1] }
 0x1d4   :  { %3252 = vmatprep.subr.mxu1 %v4824_v57  ;;  %3314 = vmatmul.mubr.f32.vlgmr.msra.gmra.mxu0 %v1774_v19  ;;  %v2503_v19 = vld [vmem:[%s5485_s4 + $0x338] sm:$0xff] }
 0x1d5   :  { %3387 = vmatprep.subr.mxu0 %v4824_v57  ;;  %3253 = vmatpush3.msra.mxu1 %v2467_v6  ;;  %v2515_v6 = vld [vmem:[%s5485_s4 + $0x398] sm:$0xff] }
 0x1d6   :  { %3388 = vmatpush3.msra.mxu0 %v2527_v29  ;;  %3254 = vmatprep.subr.mxu1 %v4824_v57  ;;  %v1772_v29 = vpop.permute.xlu0 %1771  ;;  %v2535_v39 = vld [vmem:[%s5485_s4 + $0x438] sm:$0xff] }
 0x1d7   :  { %3389 = vmatprep.subr.mxu0 %v4824_v57  ;;  %3255 = vmatpush3.msra.mxu1 %v2466_v30  ;;  %v1780_v14 = vmul.f32 %v1772_v29, %v1745_v32  ;;  %v2502_v30 = vld [vmem:[%s5485_s4 + $0x330] sm:$0xff]  ;;  %v2533_v32 = vld [vmem:[%s5485_s4 + $0x428] sm:$0xff]  ;;  %v2531_v29 = vld [vmem:[%s5485_s4 + $0x418] sm:$0xff] }
 0x1d8   :  { %3316 = vmatprep.mubr.msk.f32.mxu0 %vm3561_vm0, %v4824_v57  ;;  %3390 = vmatpush3.msra.mxu0 %v2526_v21  ;;  %v2514_v21 = vld [vmem:[%s5485_s4 + $0x390] sm:$0xff] }
 0x1d9   :  { %3256 = vmatprep.subr.mxu1 %v4824_v57  ;;  %3317 = vmatmul.mubr.f32.gmra.mxu0 %v1775_v33  ;;  %v5288_v33 = vpop.permute.xlu1 %2253 }
 0x1da   :  { %3391 = vmatprep.subr.mxu0 %v4824_v57  ;;  %3257 = vmatpush3.msra.mxu1 %v2465_v38  ;;  %v2501_v38 = vld [vmem:[%s5485_s4 + $0x328] sm:$0xff] }
 0x1db   :  { %3392 = vmatpush3.msra.mxu0 %v2525_v45  ;;  %3258 = vmatprep.subr.mxu1 %v4824_v57  ;;  %v2512_v45 = vld [vmem:[%s5485_s4 + $0x380] sm:$0xff] }
 0x1dc   :  { %3393 = vmatprep.subr.mxu0 %v4824_v57  ;;  %3259 = vmatpush3.msra.mxu1 %v2464_v17  ;;  %v1614_v17 = vmul.f32 %v4949_v59, %v1579_v49  ;;  %v2498_v59 = vld [vmem:[%s5485_s4 + $0x310] sm:$0xff]  ;;  %v3548_v49 = vld [vmem:[#allocation2 + $0x20] sm:$0xff] }
 0x1dd   :  { %3260 = vmatprep.mubr.msk.f32.mxu1 %vm3561_vm0, %v4824_v57  ;;  %3319 = vmatprep.mubr.msk.f32.mxu0 %vm3561_vm0, %v4824_v57 }
 0x1de   :  { %3394 = vmatpush3.msra.mxu0 %v2524_v9  ;;  %3261 = vmatmul.mubr.f32.vlgmr.msra.gmra.mxu1 %v1608_v1  ;;  %v2499_v9 = vld [vmem:[%s5485_s4 + $0x318] sm:$0xff]  ;;  %v2092_v1 = vpop.permute.xlu1 %2091 }
 0x1df   :  { %3320 = vmatmul.mubr.f32.gmra.mxu0 %v1776_v52  ;;  %3334 = vmatprep.subr.mxu1 %v4824_v57  ;;  %v2106_v52 = vmul.f32 %v5214_v62, %v4907_v36  ;;  %v2497_v36 = vld [vmem:[%s5485_s4 + $0x308] sm:$0xff] }
 0x1e0   :  { %3395 = vmatprep.subr.mxu0 %v4824_v57  ;;  %3335 = vmatpush3.msra.mxu1 %v2511_v28  ;;  %v5316_v28 = vpop.permute.xlu0 %2245 }
 0x1e1   :  { %3396 = vmatpush3.msra.mxu0 %v2523_v26  ;;  %3336 = vmatprep.subr.mxu1 %v4824_v57  ;;  %v2107_v26 = vmul.f32 %v5237_v63, %v4942_v58  ;;  %v1940_v58 = vmul.f32 %v4974_v54, %v1905_v13  ;;  %v2541_v54 = vld [vmem:[%s5485_s4 + $0x468] sm:$0xff] }
 0x1e2   :  { %3397 = vmatprep.subr.mxu0 %v4824_v57  ;;  %3263 = vmatprep.mubr.msk.f32.mxu1 %vm3561_vm0, %v4824_v57 }
 0x1e3   :  { %3322 = vmatprep.mubr.msk.f32.mxu0 %vm3561_vm0, %v4824_v57  ;;  %3337 = vmatpush3.msra.mxu1 %v2510_v27  ;;  %v2496_v27 = vld [vmem:[%s5485_s4 + $0x300] sm:$0xff] }
 0x1e4   :  { %3398 = vmatpush3.msra.mxu0 %v2522_v48  ;;  %3264 = vmatmul.mubr.f32.gmra.mxu1 %v1609_v55  ;;  %v2096_v48 = vpop.permute.xlu1 %2095  ;;  %v2088_v56 = vpop.permute.xlu0 %2087  ;;  %v1906_v55 = vld [vmem:[#allocation2 + $0x16] sm:$0xff] }
 0x1e5   :  { %3323 = vmatmul.mubr.f32.gmra.mxu0 %v1777_v40  ;;  %3338 = vmatprep.subr.mxu1 %v4824_v57  ;;  %v2543_v40 = vld [vmem:[%s5485_s4 + $0x478] sm:$0xff] }
 0x1e6   :  { %3399 = vmatprep.subr.mxu0 %v4824_v57  ;;  %3339 = vmatpush3.msra.mxu1 %v2509_v42  ;;  %v2108_v42 = vmul.f32 %v2088_v56, %v4976_v12  ;;  %v1907_v12 = vld [vmem:[#allocation2 + $0x1e] sm:$0xff] }
 0x1e7   :  { %3400 = vmatpush3.msra.mxu0 %v2521_v11  ;;  %3340 = vmatprep.subr.mxu1 %v4824_v57  ;;  %v2542_v11 = vld [vmem:[%s5485_s4 + $0x470] sm:$0xff]  ;;  %v1942_v62 = vmul.f32 %v5058_v61, %v1907_v12 }
 0x1e8   :  { %3401 = vmatprep.subr.mxu0 %v4824_v57  ;;  %3266 = vmatprep.mubr.msk.f32.mxu1 %vm3561_vm0, %v4824_v57  ;;  %v2076_v61 = vld [vmem:[#allocation2 + $0x37] sm:$0xff] }
 0x1e9   :  { %3325 = vmatprep.mubr.msk.f32.mxu0 %vm3561_vm0, %v4824_v57  ;;  %3341 = vmatpush3.msra.mxu1 %v2508_v15  ;;  %v1941_v15 = vmul.f32 %v5129_v31, %v1906_v55  ;;  %v2540_v31 = vld [vmem:[%s5485_s4 + $0x460] sm:$0xff] }
 0x1ea   :  { %3402 = vmatpush3.msra.mxu0 %v2520_v37  ;;  %3267 = vmatmul.mubr.f32.gmra.mxu1 %v1610_v60  ;;  %v2109_v37 = vmul.f32 %v2092_v1, %v5003_v8  ;;  %v5360_v60 = vpop.permute.xlu0 %2257  ;;  %v2539_v8 = vld [vmem:[%s5485_s4 + $0x458] sm:$0xff]  ;;  %v2243_v1 = vld [vmem:[#allocation2 + $0x40] sm:$0x1] }
 0x1eb   :  { %3326 = vmatmul.mubr.f32.gmra.mxu0 %v1778_v0  ;;  %3342 = vmatprep.subr.mxu1 %v4824_v57  ;;  %v5356_v0 = vpop.permute.xlu1 %2261 }
 0x1ec   :  { %3403 = vmatprep.subr.mxu0 %v4824_v57  ;;  %3343 = vmatpush3.msra.mxu1 %v2507_v47  ;;  %v1908_v47 = vld [vmem:[#allocation2 + $0x26] sm:$0xff] }
 0x1ed   :  { %3404 = vmatpush3.msra.mxu0 %v2519_v43  ;;  %3344 = vmatprep.subr.mxu1 %v4824_v57  ;;  %v2110_v43 = vmul.f32 %v2096_v48, %v5029_v51  ;;  %v2537_v51 = vld [vmem:[%s5485_s4 + $0x448] sm:$0xff] }
 0x1ee   :  { %3405 = vmatprep.subr.mxu0 %v4824_v57  ;;  %3269 = vmatprep.mubr.msk.f32.mxu1 %vm3561_vm0, %v4824_v57  ;;  %v2100_v50 = vpop.permute.xlu0 %2099 }
 0x1ef   :  { %3328 = vmatprep.mubr.msk.f32.mxu0 %vm3561_vm0, %v4824_v57  ;;  %3345 = vmatpush3.msra.mxu1 %v2506_v53  ;;  %v5374_v18 = vpop.permute.xlu1 %2265  ;;  %v2538_v53 = vld [vmem:[%s5485_s4 + $0x450] sm:$0xff]  ;;  %v2111_v63 = vmul.f32 %v2100_v50, %v2076_v61 }
 0x1f0   :  { %3406 = vmatpush3.msra.mxu0 %v2518_v44  ;;  %3270 = vmatmul.mubr.f32.gmra.mxu1 %v1611_v46  ;;  %v1943_v44 = vmul.f32 %v5084_v7, %v1908_v47  ;;  %v2077_v46 = vld [vmem:[#allocation2 + $0x3f] sm:$0x1]  ;;  %v2536_v7 = vld [vmem:[%s5485_s4 + $0x440] sm:$0xff] }
 0x1f1   :  { %3329 = vmatmul.mubr.f32.gmra.mxu0 %v1779_v2  ;;  %3346 = vmatprep.subr.mxu1 %v4824_v57  ;;  %v1909_v2 = vld [vmem:[#allocation2 + $0x2e] sm:$0xff] }
 0x1f2   :  { %3407 = vmatprep.subr.mxu0 %v4824_v57  ;;  %3347 = vmatpush3.msra.mxu1 %v2505_v4 }
 0x1f3   :  { %3408 = vmatpush3.msra.mxu0 %v2517_v3  ;;  %3348 = vmatprep.subr.mxu1 %v4824_v57  ;;  %v2104_v4 = vpop.permute.xlu1 %2103  ;;  %v1944_v3 = vmul.f32 %v5156_v35, %v1909_v2  ;;  %v2534_v35 = vld [vmem:[%s5485_s4 + $0x430] sm:$0xff] }
 0x1f4   :  { %3409 = vmatprep.subr.mxu0 %v4824_v57  ;;  %3272 = vmatprep.mubr.msk.f32.mxu1 %vm3561_vm0, %v4824_v57 }
 0x1f5   :  { %3349 = vmatpush3.msra.mxu1 %v2504_v16  ;;  %3410 = vmatpush3.msra.mxu0 %v2516_v10  ;;  %v2112_v16 = vmul.f32 %v2104_v4, %v2077_v46  ;;  %v1910_v10 = vld [vmem:[#allocation2 + $0x36] sm:$0xff] }
 0x1f6   :  { %3273 = vmatmul.mubr.f32.gmra.mxu1 %v1612_v22  ;;  %3350 = vmatprep.subr.mxu1 %v4824_v57  ;;  %v1945_v22 = vmul.f32 %v5162_v34, %v1910_v10 }
 0x1f7   :  { %3411 = vmatprep.subr.mxu0 %v4824_v57  ;;  %3351 = vmatpush3.msra.mxu1 %v2503_v19  ;;  %v1911_v19 = vld [vmem:[#allocation2 + $0x3e] sm:$0x1] }
 0x1f8   :  { %3412 = vmatpush3.msra.mxu0 %v2515_v6  ;;  %3352 = vmatprep.subr.mxu1 %v4824_v57  ;;  %v2532_v6 = vld [vmem:[%s5485_s4 + $0x420] sm:$0xff]  ;;  %v1946_v34 = vmul.f32 %v5186_v5, %v1911_v19  ;;  %v2529_v5 = vld [vmem:[%s5485_s4 + $0x408] sm:$0xff] }
 0x1f9   :  { %3413 = vmatprep.subr.mxu0 %v4824_v57  ;;  %3275 = vmatprep.mubr.msk.f32.mxu1 %vm3561_vm0, %v4824_v57 }
 0x1fa   :  { %3331 = vmatprep.mubr.msk.f32.mxu0 %vm3561_vm0, %v4824_v57  ;;  %3353 = vmatpush3.msra.mxu1 %v2502_v30  ;;  %v2528_v30 = vld [vmem:[%s5485_s4 + $0x400] sm:$0xff] }
 0x1fb   :  { %3414 = vmatpush3.msra.mxu0 %v2514_v21  ;;  %3276 = vmatmul.mubr.f32.gmra.mxu1 %v1613_v24  ;;  %v3545_v21 = vld [vmem:[#allocation2 + $0x10] sm:$0xff] }
 0x1fc   :  { %3332 = vmatmul.mubr.f32.gmra.mxu0 %v1780_v14  ;;  %3354 = vmatprep.subr.mxu1 %v4824_v57  ;;  %v2530_v14 = vld [vmem:[%s5485_s4 + $0x410] sm:$0xff]  ;;  %v2272_v24 = vmul.f32 %v3545_v21, %v5316_v28  ;;  %v2270_v28 = vpop.permute.xlu0 %2269 }
 0x1fd   :  { %3415 = vmatprep.subr.mxu0 %v4824_v57  ;;  %3355 = vmatpush3.msra.mxu1 %v2501_v38  ;;  %v3546_v38 = vld [vmem:[#allocation2 + $0x18] sm:$0xff] }
 0x1fe   :  { %3416 = vmatpush3.msra.mxu0 %v2513_v41  ;;  %3356 = vmatprep.subr.mxu1 %v4824_v57  ;;  %v2273_v41 = vmul.f32 %v3546_v38, %v5261_v25  ;;  %v2242_v25 = vld [vmem:[#allocation2 + $0x38] sm:$0xff] }
 0x1ff   :  { %3417 = vmatprep.subr.mxu0 %v4824_v57  ;;  %3278 = vmatprep.mubr.msk.f32.mxu1 %vm3561_vm0, %v4824_v57 }
 0x200   :  { %3357 = vmatpush3.msra.mxu1 %v2500_v23  ;;  %3418 = vmatpush3.msra.mxu0 %v2512_v45  ;;  %v3547_v23 = vld [vmem:[#allocation2] sm:$0xff]  ;;  %v2274_v45 = vmul.f32 %v3548_v49, %v5288_v33  ;;  %v2277_v33 = vmul.f32 %v5374_v18, %v2242_v25 }
 0x201   :  { %3419 = vmatprep.mubr.msk.f32.mxu0 %vm3561_vm0, %v4824_v57  ;;  %3279 = vmatmul.mubr.f32.gmra.mxu1 %v1614_v17  ;;  %v3549_v17 = vld [vmem:[#allocation2 + $0x28] sm:$0xff] }
 0x202   :  { %3358 = vmatprep.subr.mxu1 %v4824_v57  ;;  %3420 = vmatmul.mubr.f32.vlgmr.msra.gmra.mxu0 %v2106_v52 }
 0x203   :  { %3359 = vmatpush3.msra.mxu1 %v2499_v9  ;;  %3422 = vmatprep.mubr.msk.f32.mxu0 %vm3561_vm0, %v4824_v57  ;;  %v2275_v9 = vmul.f32 %v3549_v17, %v5360_v60 }
 0x204   :  { %3360 = vmatprep.subr.mxu1 %v4824_v57  ;;  %3366 = vmatprep.mubr.msk.f32.mxu1 %vm3561_vm0, %v4824_v57 }
 0x205   :  { %3361 = vmatpush3.msra.mxu1 %v2498_v59  ;;  %v2278_v59 = vmul.f32 %v2270_v28, %v2243_v1 }
 0x206   :  { %3362 = vmatprep.subr.mxu1 %v4824_v57  ;;  %3423 = vmatmul.mubr.f32.gmra.mxu0 %v2107_v26 }
 0x207   :  { %3363 = vmatpush3.msra.mxu1 %v2497_v36  ;;  %3425 = vmatprep.mubr.msk.f32.mxu0 %vm3561_vm0, %v4824_v57 }
 0x208   :  { %3364 = vmatprep.subr.mxu1 %v4824_v57 }
 0x209   :  { %3365 = vmatpush3.msra.mxu1 %v2496_v27 }
 0x20a   :  { %3367 = vmatmul.mubr.f32.vlgmr.msra.gmra.mxu1 %v1940_v58  ;;  %3440 = vmatprep.subr.mxu1 %v4824_v57 }
 0x20b   :  { %3426 = vmatmul.mubr.f32.gmra.mxu0 %v2108_v42  ;;  %3441 = vmatpush3.msra.mxu1 %v2543_v40 }
 0x20c   :  { %3442 = vmatprep.subr.mxu1 %v4824_v57  ;;  %3369 = vmatprep.mubr.msk.f32.mxu1 %vm3561_vm0, %v4824_v57 }
 0x20d   :  { %3428 = vmatprep.mubr.msk.f32.mxu0 %vm3561_vm0, %v4824_v57  ;;  %3443 = vmatpush3.msra.mxu1 %v2542_v11 }
 0x20e   :  { %3370 = vmatmul.mubr.f32.gmra.mxu1 %v1941_v15  ;;  %3444 = vmatprep.subr.mxu1 %v4824_v57 }
 0x20f   :  { %3429 = vmatmul.mubr.f32.gmra.mxu0 %v2109_v37  ;;  %3445 = vmatpush3.msra.mxu1 %v2541_v54 }
 0x210   :  { %3446 = vmatprep.subr.mxu1 %v4824_v57  ;;  %3372 = vmatprep.mubr.msk.f32.mxu1 %vm3561_vm0, %v4824_v57 }
 0x211   :  { %3431 = vmatprep.mubr.msk.f32.mxu0 %vm3561_vm0, %v4824_v57  ;;  %3447 = vmatpush3.msra.mxu1 %v2540_v31 }
 0x212   :  { %3373 = vmatmul.mubr.f32.gmra.mxu1 %v1942_v62  ;;  %3448 = vmatprep.subr.mxu1 %v4824_v57 }
 0x213   :  { %3432 = vmatmul.mubr.f32.gmra.mxu0 %v2110_v43  ;;  %3449 = vmatpush3.msra.mxu1 %v2539_v8 }
 0x214   :  { %3450 = vmatprep.subr.mxu1 %v4824_v57  ;;  %3375 = vmatprep.mubr.msk.f32.mxu1 %vm3561_vm0, %v4824_v57 }
 0x215   :  { %3434 = vmatprep.mubr.msk.f32.mxu0 %vm3561_vm0, %v4824_v57  ;;  %3451 = vmatpush3.msra.mxu1 %v2538_v53 }
 0x216   :  { %3376 = vmatmul.mubr.f32.gmra.mxu1 %v1943_v44  ;;  %3452 = vmatprep.subr.mxu1 %v4824_v57 }
 0x217   :  { %3435 = vmatmul.mubr.f32.gmra.mxu0 %v2111_v63  ;;  %3453 = vmatpush3.msra.mxu1 %v2537_v51 }
 0x218   :  { %3454 = vmatprep.subr.mxu1 %v4824_v57  ;;  %3378 = vmatprep.mubr.msk.f32.mxu1 %vm3561_vm0, %v4824_v57 }
 0x219   :  { %3455 = vmatpush3.msra.mxu1 %v2536_v7  ;;  %3437 = vmatprep.mubr.msk.f32.mxu0 %vm3561_vm0, %v4824_v57 }
 0x21a   :  { %3379 = vmatmul.mubr.f32.gmra.mxu1 %v1944_v3  ;;  %3456 = vmatprep.subr.mxu1 %v4824_v57 }
 0x21b   :  { %3457 = vmatpush3.msra.mxu1 %v2535_v39  ;;  %3381 = vmatprep.mubr.msk.f32.mxu1 %vm3561_vm0, %v4824_v57 }
 0x21c   :  { %3458 = vmatprep.subr.mxu1 %v4824_v57  ;;  %3438 = vmatmul.mubr.f32.gmra.mxu0 %v2112_v16 }
 0x21d   :  { %3459 = vmatpush3.msra.mxu1 %v2534_v35 }
 0x21e   :  { %3382 = vmatmul.mubr.f32.gmra.mxu1 %v1945_v22  ;;  %3460 = vmatprep.subr.mxu1 %v4824_v57 }
 0x21f   :  { %3461 = vmatpush3.msra.mxu1 %v2533_v32  ;;  %3384 = vmatprep.mubr.msk.f32.mxu1 %vm3561_vm0, %v4824_v57 }
 0x220   :  { %3462 = vmatprep.subr.mxu1 %v4824_v57 }
 0x221   :  { %3463 = vmatpush3.msra.mxu1 %v2532_v6 }
 0x222   :  { %3385 = vmatmul.mubr.f32.gmra.mxu1 %v1946_v34  ;;  %3464 = vmatprep.subr.mxu1 %v4824_v57 }
 0x223   :  { %3465 = vmatpush3.msra.mxu1 %v2531_v29  ;;  %3472 = vmatprep.mubr.msk.f32.mxu1 %vm3561_vm0, %v4824_v57 }
 0x224   :  { %3466 = vmatprep.subr.mxu1 %v4824_v57 }
 0x225   :  { %3467 = vmatpush3.msra.mxu1 %v2530_v14 }
 0x226   :  { %3468 = vmatprep.subr.mxu1 %v4824_v57 }
 0x227   :  { %3469 = vmatpush3.msra.mxu1 %v2529_v5 }
 0x228   :  { %3470 = vmatprep.subr.mxu1 %v4824_v57 }
 0x229   :  { %3471 = vmatpush3.msra.mxu1 %v2528_v30 }
 0x22a   :  { %3473 = vmatmul.mubr.f32.vlgmr.msra.gmra.mxu1 %v2272_v24 }
 0x22b   :  { %3475 = vmatprep.mubr.msk.f32.mxu1 %vm3561_vm0, %v4824_v57  ;;  %v3550_v57 = vld [vmem:[#allocation2 + $0x30] sm:$0xff] }
 0x22c   :  { %v2276_v52 = vmul.f32 %v3550_v57, %v5356_v0 }
 0x22e   :  { %3476 = vmatmul.mubr.f32.gmra.mxu1 %v2273_v41 }
 0x22f   :  { %3478 = vmatprep.mubr.msk.f32.mxu1 %vm3561_vm0, %v3547_v23 }
 0x232   :  { %3479 = vmatmul.mubr.f32.gmra.mxu1 %v2274_v45 }
 0x233   :  { %3481 = vmatprep.mubr.msk.f32.mxu1 %vm3561_vm0, %v3547_v23 }
 0x236   :  { %3482 = vmatmul.mubr.f32.gmra.mxu1 %v2275_v9 }
 0x237   :  { %3484 = vmatprep.mubr.msk.f32.mxu1 %vm3561_vm0, %v3547_v23 }
 0x23a   :  { %3485 = vmatmul.mubr.f32.gmra.mxu1 %v2276_v52 }
 0x23b   :  { %3487 = vmatprep.mubr.msk.f32.mxu1 %vm3561_vm0, %v3547_v23 }
 0x23e   :  { %3488 = vmatmul.mubr.f32.gmra.mxu1 %v2277_v33 }
 0x23f   :  { %3490 = vmatprep.mubr.msk.f32.mxu1 %vm3561_vm0, %v3547_v23 }
 0x242   :  { %3491 = vmatmul.mubr.f32.gmra.mxu1 %v2278_v59 }
 0x247   :  { %v1212_v36 = vpop.f32.mrf.mxu0 }
 0x249   :  { %v3106_v26 = vpop.f32.mrf.mxu0 }
 0x24b   :  { %v1217_v13 = vpop.f32.mrf.mxu0 }
 0x24d   :  { %v3109_v27 = vpop.f32.mrf.mxu0 }
 0x24f   :  { %v1222_v48 = vpop.f32.mrf.mxu0 }
 0x251   :  { %v3112_v56 = vpop.f32.mrf.mxu0  ;;  %v1107_v40 = vpop.f32.mrf.mxu1 }
 0x252   :  { %v1208_v10 = vadd.f32 %v5050_v20, %v1107_v40 }
 0x253   :  { %v1227_v58 = vpop.f32.mrf.mxu0  ;;  %v3050_v42 = vpop.f32.mrf.mxu1 }
 0x255   :  { %v3115_v55 = vpop.f32.mrf.mxu0  ;;  %v1112_v15 = vpop.f32.mrf.mxu1 }
 0x256   :  { %v1213_v54 = vadd.f32 %v1212_v36, %v1112_v15 }
 0x257   :  { %v1232_v11 = vpop.f32.mrf.mxu0  ;;  %v3053_v37 = vpop.f32.mrf.mxu1 }
 0x259   :  { %v3118_v12 = vpop.f32.mrf.mxu0  ;;  %v1117_v60 = vpop.f32.mrf.mxu1 }
 0x25a   :  { %v1218_v31 = vadd.f32 %v1217_v13, %v1117_v60 }
 0x25b   :  { %v1237_v0 = vpop.f32.mrf.mxu0  ;;  %v3056_v8 = vpop.f32.mrf.mxu1 }
 0x25d   :  { %v3121_v62 = vpop.f32.mrf.mxu0  ;;  %v1122_v43 = vpop.f32.mrf.mxu1 }
 0x25e   :  { %v1223_v18 = vadd.f32 %v1222_v48, %v1122_v43 }
 0x25f   :  { %v1532_v47 = vpop.f32.mrf.mxu0  ;;  %v3059_v61 = vpop.f32.mrf.mxu1 }
 0x261   :  { %v3209_v50 = vpop.f32.mrf.mxu0 }
 0x262   :  { %v1127_v53 = vpop.f32.mrf.mxu1 }
 0x263   :  { %v1228_v44 = vadd.f32 %v1227_v58, %v1127_v53 }
 0x264   :  { %v3062_v51 = vpop.f32.mrf.mxu1 }
 0x266   :  { %v1132_v2 = vpop.f32.mrf.mxu1 }
 0x267   :  { %v1233_v63 = vadd.f32 %v1232_v11, %v1132_v2 }
 0x268   :  { %v3065_v46 = vpop.f32.mrf.mxu1  ;;  %v1537_v4 = vpop.f32.mrf.mxu0 }
 0x26a   :  { %v1137_v7 = vpop.f32.mrf.mxu1  ;;  %v3212_v39 = vpop.f32.mrf.mxu0 }
 0x26b   :  { %v1238_v3 = vadd.f32 %v1237_v0, %v1137_v7 }
 0x26c   :  { %v3068_v16 = vpop.f32.mrf.mxu1 }
 0x270   :  { %v1542_v35 = vpop.f32.mrf.mxu0 }
 0x272   :  { %v1366_v22 = vpop.f32.mrf.mxu1  ;;  %v3215_v19 = vpop.f32.mrf.mxu0 }
 0x273   :  { %v1400_v32 = vadd.f32 %v1366_v22, %v1208_v10 }
 0x274   :  { %v3156_v6 = vpop.f32.mrf.mxu1 }
 0x275   :  { %v1566_v34 = vadd.f32 %v1532_v47, %v1400_v32 }
 0x276   :  { %v1371_v29 = vpop.f32.mrf.mxu1 }
 0x277   :  { %v1401_v14 = vadd.f32 %v1371_v29, %v1213_v54 }
 0x278   :  { %v1547_v5 = vpop.f32.mrf.mxu0  ;;  %v3159_v30 = vpop.f32.mrf.mxu1 }
 0x279   :  { %v1567_v21 = vadd.f32 %v1537_v4, %v1401_v14 }
 0x27a   :  { %v3218_v24 = vpop.f32.mrf.mxu0 }
 0x27c   :  { %v1376_v38 = vpop.f32.mrf.mxu1 }
 0x27d   :  { %v1402_v41 = vadd.f32 %v1376_v38, %v1218_v31 }
 0x27e   :  { %v1552_v23 = vpop.f32.mrf.mxu0  ;;  %v3162_v49 = vpop.f32.mrf.mxu1 }
 0x27f   :  { %v1568_v45 = vadd.f32 %v1542_v35, %v1402_v41 }
 0x280   :  { %v3221_v17 = vpop.f32.mrf.mxu0 }
 0x282   :  { %v1381_v9 = vpop.f32.mrf.mxu1 }
 0x283   :  { %v1403_v20 = vadd.f32 %v1381_v9, %v1223_v18 }
 0x284   :  { %v1557_v57 = vpop.f32.mrf.mxu0  ;;  %v3165_v52 = vpop.f32.mrf.mxu1 }
 0x285   :  { %v1569_v25 = vadd.f32 %v1547_v5, %v1403_v20 }
 0x286   :  { %v3224_v1 = vpop.f32.mrf.mxu0 }
 0x288   :  { %v1386_v28 = vpop.f32.mrf.mxu1 }
 0x289   :  { %v1404_v33 = vadd.f32 %v1386_v28, %v1228_v44 }
 0x28a   :  { %v1562_v59 = vpop.f32.mrf.mxu0  ;;  %v3168_v36 = vpop.f32.mrf.mxu1 }
 0x28b   :  { %v1570_v26 = vadd.f32 %v1552_v23, %v1404_v33 }
 0x28c   :  { %v3227_v13 = vpop.f32.mrf.mxu0 }
 0x28e   :  { %v1391_v27 = vpop.f32.mrf.mxu1 }
 0x28f   :  { %v1405_v48 = vadd.f32 %v1391_v27, %v1233_v63 }
 0x290   :  { %v3171_v56 = vpop.f32.mrf.mxu1 }
 0x291   :  { %v1571_v58 = vadd.f32 %v1557_v57, %v1405_v48 }
 0x293   :  { %v1396_v40 = vpop.f32.mrf.mxu1 }
 0x294   :  { %v1406_v55 = vadd.f32 %v1396_v40, %v1238_v3  ;;  %v1864_v42 = vpop.f32.mrf.mxu0 }
 0x295   :  { %v3174_v11 = vpop.f32.mrf.mxu1 }
 0x296   :  { %v3315_v15 = vpop.f32.mrf.mxu0  ;;  %v1572_v54 = vadd.f32 %v1562_v59, %v1406_v55 }
 0x299   :  { %v1869_v12 = vpop.f32.mrf.mxu0 }
 0x29b   :  { %v3318_v37 = vpop.f32.mrf.mxu0 }
 0x29e   :  { %v1698_v0 = vpop.f32.mrf.mxu1 }
 0x29f   :  { %v1874_v60 = vpop.f32.mrf.mxu0  ;;  %v1732_v31 = vadd.f32 %v1698_v0, %v1566_v34 }
 0x2a0   :  { %v3262_v62 = vpop.f32.mrf.mxu1 }
 0x2a1   :  { %v3321_v8 = vpop.f32.mrf.mxu0  ;;  %v1898_v47 = vadd.f32 %v1864_v42, %v1732_v31 }
 0x2a4   :  { %v1703_v43 = vpop.f32.mrf.mxu1 }
 0x2a5   :  { %v1879_v18 = vpop.f32.mrf.mxu0  ;;  %v1733_v50 = vadd.f32 %v1703_v43, %v1567_v21 }
 0x2a6   :  { %v3265_v61 = vpop.f32.mrf.mxu1 }
 0x2a7   :  { %v3324_v53 = vpop.f32.mrf.mxu0  ;;  %v1899_v44 = vadd.f32 %v1869_v12, %v1733_v50 }
 0x2aa   :  { %v1708_v51 = vpop.f32.mrf.mxu1 }
 0x2ab   :  { %v1884_v2 = vpop.f32.mrf.mxu0  ;;  %v1734_v63 = vadd.f32 %v1708_v51, %v1568_v45 }
 0x2ac   :  { %v3268_v46 = vpop.f32.mrf.mxu1 }
 0x2ad   :  { %v3327_v4 = vpop.f32.mrf.mxu0  ;;  %v1900_v7 = vadd.f32 %v1874_v60, %v1734_v63 }
 0x2b0   :  { %v1713_v3 = vpop.f32.mrf.mxu1 }
 0x2b1   :  { %v1889_v39 = vpop.f32.mrf.mxu0  ;;  %v1735_v16 = vadd.f32 %v1713_v3, %v1569_v25 }
 0x2b2   :  { %v3271_v10 = vpop.f32.mrf.mxu1 }
 0x2b3   :  { %v3330_v35 = vpop.f32.mrf.mxu0  ;;  %v1901_v22 = vadd.f32 %v1879_v18, %v1735_v16 }
 0x2b6   :  { %v1718_v32 = vpop.f32.mrf.mxu1 }
 0x2b7   :  { %v1736_v19 = vadd.f32 %v1718_v32, %v1570_v26 }
 0x2b8   :  { %v3274_v6 = vpop.f32.mrf.mxu1 }
 0x2b9   :  { %v1902_v34 = vadd.f32 %v1884_v2, %v1736_v19 }
 0x2bb   :  { %v1723_v29 = vpop.f32.mrf.mxu1 }
 0x2bc   :  { %v1894_v14 = vpop.f32.mrf.mxu0  ;;  %v1737_v5 = vadd.f32 %v1723_v29, %v1571_v58 }
 0x2bd   :  { %v3277_v30 = vpop.f32.mrf.mxu1 }
 0x2be   :  { %v3333_v21 = vpop.f32.mrf.mxu0  ;;  %v1903_v24 = vadd.f32 %v1889_v39, %v1737_v5 }
 0x2c1   :  { %v1728_v38 = vpop.f32.mrf.mxu1 }
 0x2c2   :  { %v1738_v41 = vadd.f32 %v1728_v38, %v1572_v54  ;;  %v2196_v23 = vpop.f32.mrf.mxu0 }
 0x2c3   :  { %v3280_v49 = vpop.f32.mrf.mxu1 }
 0x2c4   :  { %v3421_v45 = vpop.f32.mrf.mxu0  ;;  %v1904_v17 = vadd.f32 %v1894_v14, %v1738_v41 }
 0x2c6   :  { %v2201_v9 = vpop.f32.mrf.mxu0 }
 0x2c8   :  { %v3424_v20 = vpop.f32.mrf.mxu0 }
 0x2ca   :  { %v2030_v57 = vpop.f32.mrf.mxu1 }
 0x2cb   :  { %v2206_v52 = vpop.f32.mrf.mxu0  ;;  %v2064_v31 = vadd.f32 %v2030_v57, %v1898_v47 }
 0x2cc   :  { %v3368_v25 = vpop.f32.mrf.mxu1 }
 0x2cd   :  { %v3427_v1 = vpop.f32.mrf.mxu0  ;;  %v2230_v8 = vadd.f32 %v2196_v23, %v2064_v31 }
 0x2ce   :  { %v2035_v28 = vpop.f32.mrf.mxu1 }
 0x2cf   :  { %v2211_v33 = vpop.f32.mrf.mxu0  ;;  %v2065_v62 = vadd.f32 %v2035_v28, %v1899_v44 }
 0x2d0   :  { %v3371_v59 = vpop.f32.mrf.mxu1 }
 0x2d1   :  { %v3430_v36 = vpop.f32.mrf.mxu0  ;;  %v2231_v53 = vadd.f32 %v2201_v9, %v2065_v62 }
 0x2d2   :  { %v2040_v26 = vpop.f32.mrf.mxu1 }
 0x2d3   :  { %v2216_v13 = vpop.f32.mrf.mxu0  ;;  %v2066_v61 = vadd.f32 %v2040_v26, %v1900_v7 }
 0x2d4   :  { %v3374_v27 = vpop.f32.mrf.mxu1 }
 0x2d5   :  { %v3433_v48 = vpop.f32.mrf.mxu0  ;;  %v2232_v47 = vadd.f32 %v2206_v52, %v2066_v61 }
 0x2d6   :  { %v2045_v56 = vpop.f32.mrf.mxu1 }
 0x2d7   :  { %v2221_v58 = vpop.f32.mrf.mxu0  ;;  %v2067_v46 = vadd.f32 %v2045_v56, %v1901_v22 }
 0x2d8   :  { %v3377_v40 = vpop.f32.mrf.mxu1 }
 0x2d9   :  { %v3436_v55 = vpop.f32.mrf.mxu0  ;;  %v2233_v39 = vadd.f32 %v2211_v33, %v2067_v46 }
 0x2da   :  { %v2050_v42 = vpop.f32.mrf.mxu1 }
 0x2db   :  { %v2068_v7 = vadd.f32 %v2050_v42, %v1902_v34 }
 0x2dc   :  { %v3380_v11 = vpop.f32.mrf.mxu1  ;;  %v2226_v15 = vpop.f32.mrf.mxu0 }
 0x2dd   :  { %v2234_v32 = vadd.f32 %v2216_v13, %v2068_v7 }
 0x2de   :  { %v2055_v54 = vpop.f32.mrf.mxu1  ;;  %v3439_v12 = vpop.f32.mrf.mxu0 }
 0x2df   :  { %v2069_v22 = vadd.f32 %v2055_v54, %v1903_v24 }
 0x2e0   :  { %v3383_v37 = vpop.f32.mrf.mxu1 }
 0x2e1   :  { %v2235_v14 = vadd.f32 %v2221_v58, %v2069_v22 }
 0x2e2   :  { %v2060_v0 = vpop.f32.mrf.mxu1 }
 0x2e3   :  { %v2070_v34 = vadd.f32 %v2060_v0, %v1904_v17 }
 0x2e4   :  { %v3386_v60 = vpop.f32.mrf.mxu1 }
 0x2e5   :  { %v2236_v24 = vadd.f32 %v2226_v15, %v2070_v34 }
 0x2ea   :  { %v2362_v43 = vpop.f32.mrf.mxu1 }
 0x2eb   :  { %v2396_v18 = vadd.f32 %v2362_v43, %v2230_v8 }
 0x2ec   :  { %v3474_v50 = vpop.f32.mrf.mxu1 }
 0x2ed   :  { %2404 = vst.msk [vmem:[%s5488_s6] sm:$0xff] %vm2403_vm2, %v2396_v18 }
 0x2ee   :  { %v2367_v51 = vpop.f32.mrf.mxu1 }
 0x2ef   :  { %v2397_v2 = vadd.f32 %v2367_v51, %v2231_v53 }
 0x2f0   :  { %v3477_v63 = vpop.f32.mrf.mxu1 }
 0x2f1   :  { %2405 = vst.msk [vmem:[%s5488_s6 + $0x8] sm:$0xff] %vm2403_vm2, %v2397_v2 }
 0x2f2   :  { %v2372_v44 = vpop.f32.mrf.mxu1 }
 0x2f3   :  { %v2398_v4 = vadd.f32 %v2372_v44, %v2232_v47 }
 0x2f4   :  { %v3480_v3 = vpop.f32.mrf.mxu1 }
 0x2f5   :  { %2406 = vst.msk [vmem:[%s5488_s6 + $0x10] sm:$0xff] %vm2403_vm2, %v2398_v4 }
 0x2f6   :  { %v2377_v16 = vpop.f32.mrf.mxu1 }
 0x2f7   :  { %v2399_v10 = vadd.f32 %v2377_v16, %v2233_v39 }
 0x2f8   :  { %v3483_v35 = vpop.f32.mrf.mxu1 }
 0x2f9   :  { %2407 = vst.msk [vmem:[%s5488_s6 + $0x18] sm:$0xff] %vm2403_vm2, %v2399_v10 }
 0x2fa   :  { %v2382_v19 = vpop.f32.mrf.mxu1 }
 0x2fb   :  { %v2400_v6 = vadd.f32 %v2382_v19, %v2234_v32 }
 0x2fc   :  { %v3486_v29 = vpop.f32.mrf.mxu1 }
 0x2fd   :  { %2408 = vst.msk [vmem:[%s5488_s6 + $0x20] sm:$0xff] %vm2403_vm2, %v2400_v6 }
 0x2fe   :  { %v2387_v5 = vpop.f32.mrf.mxu1 }
 0x2ff   :  { %v2401_v30 = vadd.f32 %v2387_v5, %v2235_v14 }
 0x300   :  { %v3489_v21 = vpop.f32.mrf.mxu1 }
 0x301   :  { %2409 = vst.msk [vmem:[%s5488_s6 + $0x28] sm:$0xff] %vm2403_vm2, %v2401_v30 }
 0x302   :  { %v2392_v38 = vpop.f32.mrf.mxu1 }
 0x303   :  { %v2402_v41 = vadd.f32 %v2392_v38, %v2236_v24 }
 0x304   :  { %v3492_v23 = vpop.f32.mrf.mxu1 }
 0x305   :  { %2411 = vst.msk [vmem:[%s5488_s6 + $0x30] sm:$0x1] %vm2410_vm3, %v2402_v41 }

</bundles_post_ra>
